<compile_context>
chip_gen: v5e
topology: v5e:2x2
jax: 0.10.0
libtpu: 0.0.40
codegen_flags: <defaults>
</compile_context>

<pallas_src>
import jax
import jax.numpy as jnp
from jax import lax
from jax.experimental import pallas as pl
from jax.experimental.pallas import tpu as pltpu

_K_IN = 28 * 28          # 784
_H1 = 512
_H2 = 256


def _round_up(x, m):
    return (x + m - 1) // m * m


def _disc_kernel(x_ref, w1_ref, b1_ref, w2_ref, b2_ref, w3_ref, b3_ref, o_ref):
    # x_ref: (tb, 784) f32     w1: (784, 512) bf16   w2: (512, 256) bf16
    # b1: (1, 512) f32         b2: (1, 256) f32
    # w3: (1, 256) f32         b3: (1, 1) f32        o: (1, 1, tb) f32

    # In-kernel bf16 cast of the streamed activations (hidden under the MXU).
    x = x_ref[...].astype(jnp.bfloat16)

    # fc1 + LeakyReLU(0.2): bf16 MXU matmul, f32 accumulation / epilogue.
    h1 = jnp.dot(x, w1_ref[...], preferred_element_type=jnp.float32) + b1_ref[...]
    h1 = jnp.where(h1 > 0, h1, 0.2 * h1)

    # fc2 + LeakyReLU(0.2): cast activations back to bf16 for the MXU.
    h2 = jnp.dot(h1.astype(jnp.bfloat16), w2_ref[...],
                 preferred_element_type=jnp.float32) + b2_ref[...]
    h2 = jnp.where(h2 > 0, h2, 0.2 * h2)

    # fc3 (out_features = 1): contract w3 (1, 256) with h2 (tb, 256) over the
    # feature dim -> lane-dense (1, tb) logits (f32, attention-style dims).
    z = lax.dot_general(w3_ref[...], h2,
                        dimension_numbers=(((1,), (1,)), ((), ())),
                        preferred_element_type=jnp.float32) + b3_ref[...]

    # Numerically stable sigmoid on the lane-dense row (exp runs on the EUP).
    e = jnp.exp(-jnp.abs(z))
    inv = 1.0 / (1.0 + e)
    s = jnp.where(z >= 0, inv, e * inv)

    o_ref[...] = s.reshape(o_ref.shape)


def prepare_params(params):
    """One-time, kernel-ready weight prep (hoisted out of the forward pass)."""
    w1, b1, w2, b2, w3, b3 = params
    return (
        w1.astype(jnp.bfloat16),                    # (784, 512) bf16
        b1.reshape(1, _H1).astype(jnp.float32),     # (1, 512)   f32
        w2.astype(jnp.bfloat16),                    # (512, 256) bf16
        b2.reshape(1, _H2).astype(jnp.float32),     # (1, 256)   f32
        w3.reshape(1, _H2).astype(jnp.float32),     # (1, 256)   f32
        b3.reshape(1, 1).astype(jnp.float32),       # (1, 1)     f32
    )


def discriminator_forward(x_nchw, kparams, *, batch_tile=512):
    """x_nchw: (B, ...) float32 with prod(...) == 784. Returns (B, 1) f32 in [0, 1]."""
    w1_bf, b1, w2_bf, b2, w3_row, b3 = kparams
    B = x_nchw.shape[0]
    x_flat = x_nchw.reshape(B, _K_IN)            # same as torch .view(-1, 784); free

    # Batch tile: multiple of 8 sublanes, capped at ceil(B/2) so the grid has
    # >= 2 steps whenever B > 8 (both v7x TensorCores get work).
    batch_tile = max(8, _round_up(batch_tile, 8))
    b8 = _round_up(B, 8)
    half = _round_up(-(-b8 // 2), 8)
    tb = max(8, min(batch_tile, half))
    b_pad = _round_up(b8, tb)
    if b_pad != B:
        x_flat = jnp.pad(x_flat, ((0, b_pad - B), (0, 0)))

    num_tiles = b_pad // tb
    grid = (num_tiles,)

    flops = 2 * b_pad * (_K_IN * _H1 + _H1 * _H2 + _H2)
    bytes_accessed = (x_flat.size * 4 + w1_bf.size * 2 + w2_bf.size * 2
                      + b1.size * 4 + b2.size * 4 + w3_row.size * 4 + 4
                      + b_pad * 4)

    out = pl.pallas_call(
        _disc_kernel,
        out_shape=jax.ShapeDtypeStruct((num_tiles, 1, tb), jnp.float32),
        grid=grid,
        in_specs=[
            pl.BlockSpec((tb, _K_IN), lambda i: (i, 0)),     # x tile (streams, f32)
            pl.BlockSpec((_K_IN, _H1), lambda i: (0, 0)),    # w1 (resident, bf16)
            pl.BlockSpec((1, _H1), lambda i: (0, 0)),        # b1 (resident)
            pl.BlockSpec((_H1, _H2), lambda i: (0, 0)),      # w2 (resident, bf16)
            pl.BlockSpec((1, _H2), lambda i: (0, 0)),        # b2 (resident)
            pl.BlockSpec((1, _H2), lambda i: (0, 0)),        # w3 row (resident)
            pl.BlockSpec((1, 1), lambda i: (0, 0)),          # b3 (resident)
        ],
        out_specs=pl.BlockSpec((1, 1, tb), lambda i: (i, 0, 0)),  # lane-dense
        compiler_params=pltpu.CompilerParams(
            dimension_semantics=("parallel",),
            vmem_limit_bytes=32 * 1024 * 1024,
        ),
        cost_estimate=pl.CostEstimate(
            flops=flops, transcendentals=b_pad, bytes_accessed=bytes_accessed),
    )(x_flat, w1_bf, b1, w2_bf, b2, w3_row, b3)

    return out.reshape(b_pad, 1)[:B]


def init_params(key):
    """Deterministic init matching nn.Linear default (uniform +/- 1/sqrt(fan_in))."""
    ks = jax.random.split(key, 6)

    def linear(kw, kb, fan_in, fan_out):
        bound = 1.0 / jnp.sqrt(fan_in)
        w = jax.random.uniform(kw, (fan_in, fan_out), jnp.float32, -bound, bound)
        b = jax.random.uniform(kb, (1, fan_out), jnp.float32, -bound, bound)
        return w, b

    w1, b1 = linear(ks[0], ks[1], _K_IN, _H1)
    w2, b2 = linear(ks[2], ks[3], _H1, _H2)
    w3, b3 = linear(ks[4], ks[5], _H2, 1)
    return (w1, b1, w2, b2, w3, b3)


def _reference(x_nchw, params):
    """Pure-JAX reference mirroring the kernel's bf16 matmul operands."""
    w1, b1, w2, b2, w3, b3 = params
    x = x_nchw.reshape(x_nchw.shape[0], _K_IN)
    h1 = jnp.dot(x.astype(jnp.bfloat16), w1.astype(jnp.bfloat16),
                 preferred_element_type=jnp.float32) + b1
    h1 = jnp.where(h1 > 0, h1, 0.2 * h1)
    h2 = jnp.dot(h1.astype(jnp.bfloat16), w2.astype(jnp.bfloat16),
                 preferred_element_type=jnp.float32) + b2
    h2 = jnp.where(h2 > 0, h2, 0.2 * h2)
    z = h2 @ w3 + b3
    return jax.nn.sigmoid(z)


if __name__ == "__main__":
    key = jax.random.PRNGKey(0)
    k_param, k_x = jax.random.split(key)

    params = init_params(k_param)
    kparams = prepare_params(params)          # one-time weight prep

    # Small MNIST-like batch: (B, C, H, W) = (2, 1, 28, 28)
    x = jax.random.normal(k_x, (2, 1, 28, 28), jnp.float32)

    y = discriminator_forward(x, kparams)
    y = jax.block_until_ready(y)

    y_ref = _reference(x, params)
    assert y.shape == (2, 1), y.shape
    assert jnp.allclose(y, y_ref, atol=2e-3, rtol=0.0), (y, y_ref)

    print("KERNEL_OK")
</pallas_src>

<mosaic_0001>
module attributes {stable_mosaic.version = 11 : i64} {
  func.func @_disc_kernel(%arg0: i32, %arg1: memref<8x784xf32, #tpu.memory_space<vmem>>, %arg2: memref<784x512xbf16, #tpu.memory_space<vmem>>, %arg3: memref<1x512xf32, #tpu.memory_space<vmem>>, %arg4: memref<512x256xbf16, #tpu.memory_space<vmem>>, %arg5: memref<1x256xf32, #tpu.memory_space<vmem>>, %arg6: memref<1x256xf32, #tpu.memory_space<vmem>>, %arg7: memref<1x1xf32, #tpu.memory_space<vmem>>, %arg8: memref<1x1x8xf32, #tpu.memory_space<vmem>>) attributes {dimension_semantics = [#tpu.dimension_semantics<parallel>], iteration_bounds = array<i64: 1>, scalar_prefetch = 0 : i64, scratch_operands = 0 : i64, tpu.core_type = #tpu.core_type<tc>, window_params = [{transform_indices = @transform_0, window_bounds = array<i64: 8, 784>}, {pipeline_mode = #tpu.pipeline_mode<synchronous>, transform_indices = @transform_1, window_bounds = array<i64: 784, 512>}, {pipeline_mode = #tpu.pipeline_mode<synchronous>, transform_indices = @transform_2, window_bounds = array<i64: 1, 512>}, {pipeline_mode = #tpu.pipeline_mode<synchronous>, transform_indices = @transform_3, window_bounds = array<i64: 512, 256>}, {pipeline_mode = #tpu.pipeline_mode<synchronous>, transform_indices = @transform_4, window_bounds = array<i64: 1, 256>}, {pipeline_mode = #tpu.pipeline_mode<synchronous>, transform_indices = @transform_5, window_bounds = array<i64: 1, 256>}, {pipeline_mode = #tpu.pipeline_mode<synchronous>, transform_indices = @transform_6, window_bounds = array<i64: 1, 1>}, {transform_indices = @transform_7, window_bounds = array<i64: 1, 1, 8>}]} {
    %c0 = arith.constant 0 : index
    %c0_0 = arith.constant 0 : index
    %0 = vector.load %arg1[%c0, %c0_0] : memref<8x784xf32, #tpu.memory_space<vmem>>, vector<8x784xf32>
    %1 = arith.truncf %0 : vector<8x784xf32> to vector<8x784xbf16>
    %c0_1 = arith.constant 0 : index
    %c0_2 = arith.constant 0 : index
    %2 = vector.load %arg2[%c0_1, %c0_2] : memref<784x512xbf16, #tpu.memory_space<vmem>>, vector<784x512xbf16>
    %cst = arith.constant dense<0.000000e+00> : vector<8x512xf32>
    %3 = tpu.matmul %1, %2, %cst {dimension_numbers = #tpu.dot_dimension_numbers<[1], [0], [0], [1], [0, 0, 1, 1], [], []>} : vector<8x784xbf16>, vector<784x512xbf16>, vector<8x512xf32> -> vector<8x512xf32>
    %c0_3 = arith.constant 0 : index
    %c0_4 = arith.constant 0 : index
    %4 = vector.load %arg3[%c0_3, %c0_4] : memref<1x512xf32, #tpu.memory_space<vmem>>, vector<1x512xf32>
    %5 = vector.broadcast %4 : vector<1x512xf32> to vector<8x512xf32>
    %6 = arith.addf %3, %5 : vector<8x512xf32>
    %cst_5 = arith.constant 0.000000e+00 : f32
    %7 = vector.broadcast %cst_5 : f32 to vector<8x512xf32>
    %8 = arith.cmpf ogt, %6, %7 : vector<8x512xf32>
    %cst_6 = arith.constant 2.000000e-01 : f32
    %9 = vector.broadcast %cst_6 : f32 to vector<8x512xf32>
    %10 = arith.mulf %9, %6 : vector<8x512xf32>
    %11 = arith.select %8, %6, %10 : vector<8x512xi1>, vector<8x512xf32>
    %12 = arith.truncf %11 : vector<8x512xf32> to vector<8x512xbf16>
    %c0_7 = arith.constant 0 : index
    %c0_8 = arith.constant 0 : index
    %13 = vector.load %arg4[%c0_7, %c0_8] : memref<512x256xbf16, #tpu.memory_space<vmem>>, vector<512x256xbf16>
    %cst_9 = arith.constant dense<0.000000e+00> : vector<8x256xf32>
    %14 = tpu.matmul %12, %13, %cst_9 {dimension_numbers = #tpu.dot_dimension_numbers<[1], [0], [0], [1], [0, 0, 1, 1], [], []>} : vector<8x512xbf16>, vector<512x256xbf16>, vector<8x256xf32> -> vector<8x256xf32>
    %c0_10 = arith.constant 0 : index
    %c0_11 = arith.constant 0 : index
    %15 = vector.load %arg5[%c0_10, %c0_11] : memref<1x256xf32, #tpu.memory_space<vmem>>, vector<1x256xf32>
    %16 = vector.broadcast %15 : vector<1x256xf32> to vector<8x256xf32>
    %17 = arith.addf %14, %16 : vector<8x256xf32>
    %cst_12 = arith.constant 0.000000e+00 : f32
    %18 = vector.broadcast %cst_12 : f32 to vector<8x256xf32>
    %19 = arith.cmpf ogt, %17, %18 : vector<8x256xf32>
    %cst_13 = arith.constant 2.000000e-01 : f32
    %20 = vector.broadcast %cst_13 : f32 to vector<8x256xf32>
    %21 = arith.mulf %20, %17 : vector<8x256xf32>
    %22 = arith.select %19, %17, %21 : vector<8x256xi1>, vector<8x256xf32>
    %c0_14 = arith.constant 0 : index
    %c0_15 = arith.constant 0 : index
    %23 = vector.load %arg6[%c0_14, %c0_15] : memref<1x256xf32, #tpu.memory_space<vmem>>, vector<1x256xf32>
    %cst_16 = arith.constant dense<0.000000e+00> : vector<1x8xf32>
    %24 = tpu.matmul %23, %22, %cst_16 {dimension_numbers = #tpu.dot_dimension_numbers<[1], [1], [0], [0], [0, 0, 1, 0], [], []>} : vector<1x256xf32>, vector<8x256xf32>, vector<1x8xf32> -> vector<1x8xf32>
    %c0_17 = arith.constant 0 : index
    %c0_18 = arith.constant 0 : index
    %25 = vector.load %arg7[%c0_17, %c0_18] : memref<1x1xf32, #tpu.memory_space<vmem>>, vector<1x1xf32>
    %26 = vector.broadcast %25 : vector<1x1xf32> to vector<1x8xf32>
    %27 = arith.addf %24, %26 : vector<1x8xf32>
    %28 = math.absf %27 : vector<1x8xf32>
    %cst_19 = arith.constant 0.000000e+00 : f32
    %29 = vector.broadcast %cst_19 : f32 to vector<1x8xf32>
    %30 = arith.subf %29, %28 : vector<1x8xf32>
    %31 = math.exp %30 : vector<1x8xf32>
    %cst_20 = arith.constant 1.000000e+00 : f32
    %32 = vector.broadcast %cst_20 : f32 to vector<1x8xf32>
    %33 = arith.addf %32, %31 : vector<1x8xf32>
    %cst_21 = arith.constant 1.000000e+00 : f32
    %34 = vector.broadcast %cst_21 : f32 to vector<1x8xf32>
    %35 = arith.divf %34, %33 : vector<1x8xf32>
    %cst_22 = arith.constant 0.000000e+00 : f32
    %36 = vector.broadcast %cst_22 : f32 to vector<1x8xf32>
    %37 = arith.cmpf oge, %27, %36 : vector<1x8xf32>
    %38 = arith.mulf %31, %35 : vector<1x8xf32>
    %39 = arith.select %37, %35, %38 : vector<1x8xi1>, vector<1x8xf32>
    %40 = vector.shape_cast %39 : vector<1x8xf32> to vector<1x1x8xf32>
    %c0_23 = arith.constant 0 : index
    %c0_24 = arith.constant 0 : index
    %c0_25 = arith.constant 0 : index
    %41 = vector.load %arg8[%c0_23, %c0_24, %c0_25] : memref<1x1x8xf32, #tpu.memory_space<vmem>>, vector<1x1x8xf32>
    tpu.vector_store %arg8[%c0_23, %c0_24, %c0_25], %40 {strides = array<i32>} : memref<1x1x8xf32, #tpu.memory_space<vmem>>, vector<1x1x8xf32>,
    return
  }
  func.func @transform_0(%arg0: i32) -> (i32, i32) {
    %c0_i32 = arith.constant 0 : i32
    %c0_i32_0 = arith.constant 0 : i32
    return %arg0, %c0_i32 : i32, i32
  }
  func.func @transform_1(%arg0: i32) -> (i32, i32) {
    %c0_i32 = arith.constant 0 : i32
    %c0_i32_0 = arith.constant 0 : i32
    %c0_i32_1 = arith.constant 0 : i32
    return %c0_i32, %c0_i32_0 : i32, i32
  }
  func.func @transform_2(%arg0: i32) -> (i32, i32) {
    %c0_i32 = arith.constant 0 : i32
    %c0_i32_0 = arith.constant 0 : i32
    %c0_i32_1 = arith.constant 0 : i32
    return %c0_i32, %c0_i32_0 : i32, i32
  }
  func.func @transform_3(%arg0: i32) -> (i32, i32) {
    %c0_i32 = arith.constant 0 : i32
    %c0_i32_0 = arith.constant 0 : i32
    %c0_i32_1 = arith.constant 0 : i32
    return %c0_i32, %c0_i32_0 : i32, i32
  }
  func.func @transform_4(%arg0: i32) -> (i32, i32) {
    %c0_i32 = arith.constant 0 : i32
    %c0_i32_0 = arith.constant 0 : i32
    %c0_i32_1 = arith.constant 0 : i32
    return %c0_i32, %c0_i32_0 : i32, i32
  }
  func.func @transform_5(%arg0: i32) -> (i32, i32) {
    %c0_i32 = arith.constant 0 : i32
    %c0_i32_0 = arith.constant 0 : i32
    %c0_i32_1 = arith.constant 0 : i32
    return %c0_i32, %c0_i32_0 : i32, i32
  }
  func.func @transform_6(%arg0: i32) -> (i32, i32) {
    %c0_i32 = arith.constant 0 : i32
    %c0_i32_0 = arith.constant 0 : i32
    %c0_i32_1 = arith.constant 0 : i32
    return %c0_i32, %c0_i32_0 : i32, i32
  }
  func.func @transform_7(%arg0: i32) -> (i32, i32, i32) {
    %c0_i32 = arith.constant 0 : i32
    %c0_i32_0 = arith.constant 0 : i32
    %c0_i32_1 = arith.constant 0 : i32
    return %arg0, %c0_i32, %c0_i32_0 : i32, i32, i32
  }
}

</mosaic_0001>

<bundles_post_ra>
// kernel: tpu_custom_call.1
= control target key start
LH: loop header
LB: loop body
LE: loop exit
PB: predicated region body
PF: predicated region fallthrough
CT: control target
= control target key end

     0   :  { %s3862_s0 = inlined_call_operand.hbm [shape: f32[8,784], index: 0, kind: input, shape index: {}]   ;;  %s3863_s1 = inlined_call_operand.hbm [shape: bf16[784,512], index: 1, kind: input, shape index: {}]   ;;  %s3864_s2 = inlined_call_operand.hbm [shape: f32[1,512], index: 2, kind: input, shape index: {}]   ;;  %s3865_s3 = inlined_call_operand.hbm [shape: bf16[512,256], index: 3, kind: input, shape index: {}]   ;;  %s3866_s4 = inlined_call_operand.vmem [shape: f32[1,256], index: 4, kind: input, shape index: {}]   ;;  %s3867_s5 = inlined_call_operand.vmem [shape: f32[1,256], index: 5, kind: input, shape index: {}]   ;;  %s3868_s6 = inlined_call_operand.<no memory space> [shape: f32[1,1], index: 6, kind: input, shape index: {}]   ;;  %s3869_s7 = inlined_call_operand.hbm [shape: f32[1,1,8], index: 7, kind: output, shape index: {}]  }
   0x1   :  { %v12_v0 = vstv %s3868_s6 }
   0x2   :  { %13 = vst [vmem:[#allocation2] sm:$0x1] %v12_v0 }
   0x3   :  { %14 = vsyncpa [#allocation4], 0 }
   0x4   :  { %15 = vsyncpa [#allocation7], 0 }
   0x5   :  { %16 = vsyncpa [#allocation10], 0  ;;  %s33_s28 = sshll.u32 %s3863_s1, 4  ;;  %s34_s28 = int_to_ptr.hbm [resolvable:$true] %s33_s28 }
   0x6   :  { %17 = vsyncpa [#allocation5], 0  ;;  %s3717_s29 = smov [#allocation6]   ;;  %s23_s10 = sshll.u32 %s3862_s0, 4  ;;  %s24_s10 = int_to_ptr.hbm [resolvable:$true] %s23_s10 }
   0x7   :  { %s35_s30 = sshll.u32 %s3717_s29, 4  ;;  %s3718_s11 = smov 256   ;;  %s36_s30 = int_to_ptr.vmem [resolvable:$true] %s35_s30 }
   0x8   :  { %s3719_s12 = smov 16   ;;  %s3720_s6 = smov [#allocation3]  }
   0x9   :  { %41 = dma.hbm_to_vmem [thread:$0]  %s34_s28, 25088, %s36_s30, [#allocation7], %s3718_s11, %s3718_s11, %s3719_s12  }
   0xa   :  { %s25_s13 = sshll.u32 %s3720_s6, 4  ;;  %s47_s16 = sshll.u32 %s3864_s2, 4  ;;  %s26_s13 = int_to_ptr.vmem [resolvable:$true] %s25_s13  ;;  %s48_s16 = int_to_ptr.hbm [resolvable:$true] %s47_s16 }
   0xb   :  { %28 = dma.hbm_to_vmem [thread:$0]  %s24_s10, 896, %s26_s13, [#allocation4]  }
   0xc   :  { %s57_s18 = sshll.u32 %s3865_s3, 4  ;;  %s3721_s19 = smov [#allocation8]   ;;  %s58_s18 = int_to_ptr.hbm [resolvable:$true] %s57_s18 }
   0xd   :  { %s49_s20 = sshll.u32 %s3721_s19, 4  ;;  %s3722_s0 = smov [#allocation9]   ;;  %s50_s20 = int_to_ptr.vmem [resolvable:$true] %s49_s20 }
   0xe   :  { %52 = dma.hbm_to_vmem [thread:$0]  %s48_s16, 64, %s50_s20, [#allocation7]  }
   0xf   :  { %s59_s21 = sshll.u32 %s3722_s0, 4  ;;  %s3723_s22 = smov 128   ;;  %s60_s21 = int_to_ptr.vmem [resolvable:$true] %s59_s21 }
  0x10   :  { %s3724_s23 = smov 8  }
  0x11   :  { %65 = dma.hbm_to_vmem [thread:$0]  %s58_s18, 8192, %s60_s21, [#allocation10], %s3723_s22, %s3723_s22, %s3724_s23  }
  0x12   :  { %3709 = dma.done.wait [#allocation4], 896  }
  0x13   :  { %3710 = vsyncadd [#allocation4], 4294966400 }
  0x14   :  { %3711 = dma.done.wait [#allocation7], 25152  }
  0x15   :  { %3712 = vsyncadd [#allocation7], 4294942144 }
  0x16   :  { %3713 = dma.done.wait [#allocation10], 8192  }
  0x17   :  { %3714 = vsyncadd [#allocation10], 4294959104  ;;  %v2384_v1 = vld [vmem:[#allocation6 + $0xe0] sm:$0xf]  ;;  %v3344_v2 = vld [vmem:[#allocation6 + $0xec] sm:$0xf0] }
  0x18   :  { %v2512_v3 = vld [vmem:[#allocation6 + $0x1e0] sm:$0xf]  ;;  %v2385_v4 = vor.u32 %v3344_v2, %v2384_v1  ;;  %v3376_v5 = vld [vmem:[#allocation6 + $0x1ec] sm:$0xf0]  ;;  %vm1289_vm0 = vcmask 130048   ;;  %s2258_s28 = sshll.u32 %s3869_s7, 4  ;;  %s2259_s28 = int_to_ptr.hbm [resolvable:$true] %s2258_s28 }
  0x19   :  { %v2640_v6 = vld [vmem:[#allocation6 + $0x2e0] sm:$0xf]  ;;  %v3408_v7 = vld [vmem:[#allocation6 + $0x2ec] sm:$0xf0]  ;;  %v2513_v8 = vor.u32 %v3376_v5, %v2512_v3  ;;  %vm2249_vm11 = vcmask 57344  }
  0x1a   :  { %v2641_v9 = vor.u32 %v3408_v7, %v2640_v6  ;;  %v2768_v10 = vld [vmem:[#allocation6 + $0x3e0] sm:$0xf]  ;;  %v3440_v11 = vld [vmem:[#allocation6 + $0x3ec] sm:$0xf0]  ;;  %1293 = vmatpush.bf16.msra.mxu0 %v2385_v4 }
  0x1b   :  { %v2368_v12 = vld [vmem:[#allocation6 + $0xc0] sm:$0xf]  ;;  %v2769_v13 = vor.u32 %v3440_v11, %v2768_v10  ;;  %v3340_v14 = vld [vmem:[#allocation6 + $0xcc] sm:$0xf0]  ;;  %1306 = vmatpush.bf16.msra.mxu1 %v2513_v8 }
  0x1c   :  { %v2496_v15 = vld [vmem:[#allocation6 + $0x1c0] sm:$0xf]  ;;  %v3372_v16 = vld [vmem:[#allocation6 + $0x1cc] sm:$0xf0]  ;;  %1319 = vmatpush.bf16.msra.mxu2 %v2641_v9  ;;  %v2369_v17 = vor.u32 %v3340_v14, %v2368_v12 }
  0x1d   :  { %v2497_v18 = vor.u32 %v3372_v16, %v2496_v15  ;;  %v2624_v19 = vld [vmem:[#allocation6 + $0x2c0] sm:$0xf]  ;;  %v3404_v20 = vld [vmem:[#allocation6 + $0x2cc] sm:$0xf0]  ;;  %1332 = vmatpush.bf16.msra.mxu3 %v2769_v13 }
  0x1e   :  { %v2752_v21 = vld [vmem:[#allocation6 + $0x3c0] sm:$0xf]  ;;  %v2625_v22 = vor.u32 %v3404_v20, %v2624_v19  ;;  %v3436_v23 = vld [vmem:[#allocation6 + $0x3cc] sm:$0xf0]  ;;  %1294 = vmatpush.bf16.msra.mxu0 %v2369_v17 }
  0x1f   :  { %v2352_v24 = vld [vmem:[#allocation6 + $0xa0] sm:$0xf]  ;;  %v3336_v25 = vld [vmem:[#allocation6 + $0xac] sm:$0xf0]  ;;  %v2753_v26 = vor.u32 %v3436_v23, %v2752_v21  ;;  %1307 = vmatpush.bf16.msra.mxu1 %v2497_v18 }
  0x20   :  { %v2480_v27 = vld [vmem:[#allocation6 + $0x1a0] sm:$0xf]  ;;  %v3368_v28 = vld [vmem:[#allocation6 + $0x1ac] sm:$0xf0]  ;;  %v2353_v30 = vor.u32 %v3336_v25, %v2352_v24  ;;  %1320 = vmatpush.bf16.msra.mxu2 %v2625_v22 }
  0x21   :  { %v2608_v29 = vld [vmem:[#allocation6 + $0x2a0] sm:$0xf]  ;;  %v3400_v31 = vld [vmem:[#allocation6 + $0x2ac] sm:$0xf0]  ;;  %v2481_v34 = vor.u32 %v3368_v28, %v2480_v27  ;;  %1333 = vmatpush.bf16.msra.mxu3 %v2753_v26 }
  0x22   :  { %v2736_v32 = vld [vmem:[#allocation6 + $0x3a0] sm:$0xf]  ;;  %v3432_v33 = vld [vmem:[#allocation6 + $0x3ac] sm:$0xf0]  ;;  %v2609_v35 = vor.u32 %v3400_v31, %v2608_v29  ;;  %1295 = vmatpush.bf16.msra.mxu0 %v2353_v30 }
  0x23   :  { %v2336_v36 = vld [vmem:[#allocation6 + $0x80] sm:$0xf]  ;;  %v3332_v37 = vld [vmem:[#allocation6 + $0x8c] sm:$0xf0]  ;;  %v2737_v39 = vor.u32 %v3432_v33, %v2736_v32  ;;  %1308 = vmatpush.bf16.msra.mxu1 %v2481_v34  ;;  %v3342_v34 = vld [vmem:[#allocation6 + $0xe4] sm:$0xf] }
  0x24   :  { %v2464_v38 = vld [vmem:[#allocation6 + $0x180] sm:$0xf]  ;;  %v3364_v40 = vld [vmem:[#allocation6 + $0x18c] sm:$0xf0]  ;;  %v2337_v45 = vor.u32 %v3332_v37, %v2336_v36  ;;  %1321 = vmatpush.bf16.msra.mxu2 %v2609_v35  ;;  %v2386_v35 = vld [vmem:[#allocation6 + $0xf0] sm:$0xf0] }
  0x25   :  { %v2592_v41 = vld [vmem:[#allocation6 + $0x280] sm:$0xf]  ;;  %v3396_v42 = vld [vmem:[#allocation6 + $0x28c] sm:$0xf0]  ;;  %v2465_v46 = vor.u32 %v3364_v40, %v2464_v38  ;;  %1334 = vmatpush.bf16.msra.mxu3 %v2737_v39  ;;  %v91_v36 = vld [vmem:[#allocation3 + $0x10] sm:$0xff] }
  0x26   :  { %v2720_v43 = vld [vmem:[#allocation6 + $0x380] sm:$0xf]  ;;  %v3428_v44 = vld [vmem:[#allocation6 + $0x38c] sm:$0xf0]  ;;  %v2593_v47 = vor.u32 %v3396_v42, %v2592_v41  ;;  %1296 = vmatpush.bf16.msra.mxu0 %v2337_v45  ;;  %v89_v41 = vld [vmem:[#allocation3] sm:$0xff] }
  0x27   :  { %v2320_v48 = vld [vmem:[#allocation6 + $0x60] sm:$0xf]  ;;  %v3328_v49 = vld [vmem:[#allocation6 + $0x6c] sm:$0xf0]  ;;  %v2721_v51 = vor.u32 %v3428_v44, %v2720_v43  ;;  %1309 = vmatpush.bf16.msra.mxu1 %v2465_v46  ;;  %v3374_v44 = vld [vmem:[#allocation6 + $0x1e4] sm:$0xf] }
  0x28   :  { %v2448_v50 = vld [vmem:[#allocation6 + $0x160] sm:$0xf]  ;;  %v3360_v52 = vld [vmem:[#allocation6 + $0x16c] sm:$0xf0]  ;;  %v2321_v57 = vor.u32 %v3328_v49, %v2320_v48  ;;  %1322 = vmatpush.bf16.msra.mxu2 %v2593_v47  ;;  %v2514_v45 = vld [vmem:[#allocation6 + $0x1f0] sm:$0xf0]  ;;  %v2389_v48 = vor.u32 %v3342_v34, %v2386_v35 }
  0x29   :  { %v2576_v53 = vld [vmem:[#allocation6 + $0x260] sm:$0xf]  ;;  %v3392_v54 = vld [vmem:[#allocation6 + $0x26c] sm:$0xf0]  ;;  %v2449_v58 = vor.u32 %v3360_v52, %v2448_v50  ;;  %1335 = vmatpush.bf16.msra.mxu3 %v2721_v51  ;;  %v3782_v52 = vpack.c.bf16 %v91_v36, %v91_v36  ;;  %v3358_v36 = vld [vmem:[#allocation6 + $0x164] sm:$0xf] }
  0x2a   :  { %v2704_v55 = vld [vmem:[#allocation6 + $0x360] sm:$0xf]  ;;  %v3424_v56 = vld [vmem:[#allocation6 + $0x36c] sm:$0xf0]  ;;  %v2577_v59 = vor.u32 %v3392_v54, %v2576_v53  ;;  %1297 = vmatpush.bf16.msra.mxu0 %v2321_v57  ;;  %v3338_v54 = vld [vmem:[#allocation6 + $0xc4] sm:$0xf] }
  0x2b   :  { %v2304_v60 = vld [vmem:[#allocation6 + $0x40] sm:$0xf]  ;;  %v3324_v61 = vld [vmem:[#allocation6 + $0x4c] sm:$0xf0]  ;;  %v2705_v63 = vor.u32 %v3424_v56, %v2704_v55  ;;  %1310 = vmatpush.bf16.msra.mxu1 %v2449_v58  ;;  %v2370_v55 = vld [vmem:[#allocation6 + $0xd0] sm:$0xf0]  ;;  %v3784_v56 = vpack.c.bf16 %v89_v41, %v89_v41 }
  0x2c   :  { %v2432_v62 = vld [vmem:[#allocation6 + $0x140] sm:$0xf]  ;;  %v3356_v0 = vld [vmem:[#allocation6 + $0x14c] sm:$0xf0]  ;;  %v2305_v5 = vor.u32 %v3324_v61, %v2304_v60  ;;  %1323 = vmatpush.bf16.msra.mxu2 %v2577_v59  ;;  %v2517_v60 = vor.u32 %v3374_v44, %v2514_v45  ;;  %v3322_v44 = vld [vmem:[#allocation6 + $0x44] sm:$0xf] }
  0x2d   :  { %v2560_v1 = vld [vmem:[#allocation6 + $0x240] sm:$0xf]  ;;  %v3388_v2 = vld [vmem:[#allocation6 + $0x24c] sm:$0xf0]  ;;  %v2433_v6 = vor.u32 %v3356_v0, %v2432_v62  ;;  %1336 = vmatpush.bf16.msra.mxu3 %v2705_v63  ;;  %v3370_v62 = vld [vmem:[#allocation6 + $0x1c4] sm:$0xf] }
  0x2e   :  { %v2688_v3 = vld [vmem:[#allocation6 + $0x340] sm:$0xf]  ;;  %v3420_v4 = vld [vmem:[#allocation6 + $0x34c] sm:$0xf0]  ;;  %v2561_v7 = vor.u32 %v3388_v2, %v2560_v1  ;;  %1298 = vmatpush.bf16.msra.mxu0 %v2305_v5  ;;  %v2498_v63 = vld [vmem:[#allocation6 + $0x1d0] sm:$0xf0]  ;;  %v2373_v1 = vor.u32 %v3338_v54, %v2370_v55 }
  0x2f   :  { %v2288_v8 = vld [vmem:[#allocation6 + $0x20] sm:$0xf]  ;;  %v3320_v9 = vld [vmem:[#allocation6 + $0x2c] sm:$0xf0]  ;;  %v2689_v11 = vor.u32 %v3420_v4, %v2688_v3  ;;  %1311 = vmatpush.bf16.msra.mxu1 %v2433_v6  ;;  %v3334_v6 = vld [vmem:[#allocation6 + $0xa4] sm:$0xf] }
  0x30   :  { %v2416_v10 = vld [vmem:[#allocation6 + $0x120] sm:$0xf]  ;;  %v3352_v12 = vld [vmem:[#allocation6 + $0x12c] sm:$0xf0]  ;;  %v2289_v17 = vor.u32 %v3320_v9, %v2288_v8  ;;  %1324 = vmatpush.bf16.msra.mxu2 %v2561_v7  ;;  %v2354_v7 = vld [vmem:[#allocation6 + $0xb0] sm:$0xf0]  ;;  %v2501_v9 = vor.u32 %v3370_v62, %v2498_v63 }
  0x31   :  { %v2544_v13 = vld [vmem:[#allocation6 + $0x220] sm:$0xf]  ;;  %v3384_v14 = vld [vmem:[#allocation6 + $0x22c] sm:$0xf0]  ;;  %v2417_v21 = vor.u32 %v3352_v12, %v2416_v10  ;;  %1337 = vmatpush.bf16.msra.mxu3 %v2689_v11  ;;  %v3366_v11 = vld [vmem:[#allocation6 + $0x1a4] sm:$0xf] }
  0x32   :  { %v2672_v15 = vld [vmem:[#allocation6 + $0x320] sm:$0xf]  ;;  %v3416_v16 = vld [vmem:[#allocation6 + $0x32c] sm:$0xf0]  ;;  %v2545_v22 = vor.u32 %v3384_v14, %v2544_v13  ;;  %1299 = vmatpush.bf16.msra.mxu0 %v2289_v17  ;;  %v2482_v12 = vld [vmem:[#allocation6 + $0x1b0] sm:$0xf0]  ;;  %v2357_v14 = vor.u32 %v3334_v6, %v2354_v7 }
  0x33   :  { %v2272_v18 = vld [vmem:[#allocation6] sm:$0xf]  ;;  %v3316_v19 = vld [vmem:[#allocation6 + $0xc] sm:$0xf0]  ;;  %v2673_v26 = vor.u32 %v3416_v16, %v2672_v15  ;;  %1312 = vmatpush.bf16.msra.mxu1 %v2417_v21  ;;  %v2485_v21 = vor.u32 %v3366_v11, %v2482_v12  ;;  %v2306_v45 = vld [vmem:[#allocation6 + $0x50] sm:$0xf0] }
  0x34   :  { %v2400_v20 = vld [vmem:[#allocation6 + $0x100] sm:$0xf]  ;;  %v3348_v23 = vld [vmem:[#allocation6 + $0x10c] sm:$0xf0]  ;;  %v2273_v33 = vor.u32 %v3316_v19, %v2272_v18  ;;  %1325 = vmatpush.bf16.msra.mxu2 %v2545_v22  ;;  %v3330_v19 = vld [vmem:[#allocation6 + $0x84] sm:$0xf] }
  0x35   :  { %v2528_v24 = vld [vmem:[#allocation6 + $0x200] sm:$0xf]  ;;  %v3380_v25 = vld [vmem:[#allocation6 + $0x20c] sm:$0xf0]  ;;  %v2401_v37 = vor.u32 %v3348_v23, %v2400_v20  ;;  %1338 = vmatpush.bf16.msra.mxu3 %v2673_v26  ;;  %v2338_v20 = vld [vmem:[#allocation6 + $0x90] sm:$0xf0] }
  0x36   :  { %v2656_v27 = vld [vmem:[#allocation6 + $0x300] sm:$0xf]  ;;  %v3412_v28 = vld [vmem:[#allocation6 + $0x30c] sm:$0xf0]  ;;  %v2529_v38 = vor.u32 %v3380_v25, %v2528_v24  ;;  %1300 = vmatpush.bf16.msra.mxu0 %v2273_v33  ;;  %v3362_v23 = vld [vmem:[#allocation6 + $0x184] sm:$0xf]  ;;  %v2341_v26 = vor.u32 %v3330_v19, %v2338_v20 }
  0x37   :  { %v2896_v29 = vld [vmem:[#allocation6 + $0x4e0] sm:$0xf]  ;;  %v3472_v30 = vld [vmem:[#allocation6 + $0x4ec] sm:$0xf0]  ;;  %v2657_v42 = vor.u32 %v3412_v28, %v2656_v27  ;;  %1313 = vmatpush.bf16.msra.mxu1 %v2401_v37  ;;  %v2466_v24 = vld [vmem:[#allocation6 + $0x190] sm:$0xf0] }
  0x38   :  { %v3024_v31 = vld [vmem:[#allocation6 + $0x5e0] sm:$0xf]  ;;  %v3504_v32 = vld [vmem:[#allocation6 + $0x5ec] sm:$0xf0]  ;;  %v2897_v43 = vor.u32 %v3472_v30, %v2896_v29  ;;  %1326 = vmatpush.bf16.msra.mxu2 %v2529_v38  ;;  %v95_v33 = vld [vmem:[#allocation3 + $0x30] sm:$0xff]  ;;  %v2469_v34 = vor.u32 %v3362_v23, %v2466_v24 }
  0x39   :  { %v3040_v39 = vld [vmem:[#allocation6 + $0x600] sm:$0xf]  ;;  %v3508_v40 = vld [vmem:[#allocation6 + $0x60c] sm:$0xf0]  ;;  %v3025_v47 = vor.u32 %v3504_v32, %v3024_v31  ;;  %1339 = vmatpush.bf16.msra.mxu3 %v2657_v42  ;;  %1301 = vmatmul.bf16.vlgmr.msra.gmra.mxu0 %v3784_v56  ;;  %v3326_v31 = vld [vmem:[#allocation6 + $0x64] sm:$0xf] }
  0x3a   :  { %v92_v46 = vld [vmem:[#allocation3 + $0x18] sm:$0xff]  ;;  %v3468_v50 = vld [vmem:[#allocation6 + $0x4cc] sm:$0xf0]  ;;  %v3041_v57 = vor.u32 %v3508_v40, %v3040_v39  ;;  %1345 = vmatpush.bf16.msrb.mxu0 %v2897_v43  ;;  %v2322_v32 = vld [vmem:[#allocation6 + $0x70] sm:$0xf0] }
  0x3b   :  { %v2880_v49 = vld [vmem:[#allocation6 + $0x4c0] sm:$0xf]  ;;  %v3500_v53 = vld [vmem:[#allocation6 + $0x5cc] sm:$0xf0]  ;;  %v3786_v58 = vpack.c.bf16 %v92_v46, %v92_v46  ;;  %1358 = vmatpush.bf16.msrb.mxu1 %v3025_v47  ;;  %1327 = vmatmul.bf16.vlgmr.msra.gmra.mxu2 %v3782_v52  ;;  %v2450_v37 = vld [vmem:[#allocation6 + $0x170] sm:$0xf0]  ;;  %v2325_v39 = vor.u32 %v3326_v31, %v2322_v32  ;;  %v3794_v46 = vpack.c.bf16 %v95_v33, %v95_v33 }
  0x3c   :  { %v3008_v51 = vld [vmem:[#allocation6 + $0x5c0] sm:$0xf]  ;;  %v90_v59 = vld [vmem:[#allocation3 + $0x8] sm:$0xff]  ;;  %v2881_v61 = vor.u32 %v3468_v50, %v2880_v49  ;;  %1378 = vmatpush.bf16.msrb.mxu2 %v3041_v57  ;;  %v2453_v47 = vor.u32 %v3358_v36, %v2450_v37  ;;  %v3354_v49 = vld [vmem:[#allocation6 + $0x144] sm:$0xf] }
  0x3d   :  { %1384 = vmatpush.bf16.msrb.mxu3 %v2389_v48  ;;  %v3009_v0 = vor.u32 %v3500_v53, %v3008_v51  ;;  %v2864_v2 = vld [vmem:[#allocation6 + $0x4a0] sm:$0xf]  ;;  %v3464_v3 = vld [vmem:[#allocation6 + $0x4ac] sm:$0xf0]  ;;  %v3790_v8 = vpack.c.bf16 %v90_v59, %v90_v59  ;;  %v2434_v50 = vld [vmem:[#allocation6 + $0x150] sm:$0xf0]  ;;  %v2309_v53 = vor.u32 %v3322_v44, %v2306_v45 }
  0x3e   :  { %v2992_v4 = vld [vmem:[#allocation6 + $0x5a0] sm:$0xf]  ;;  %v3496_v5 = vld [vmem:[#allocation6 + $0x5ac] sm:$0xf0]  ;;  %1340 = vmatmul.bf16.vlgmr.msra.gmra.mxu3 %v3786_v58  ;;  %1346 = vmatpush.bf16.msrb.mxu0 %v2881_v61  ;;  %v2865_v10 = vor.u32 %v3464_v3, %v2864_v2  ;;  %v2290_v61 = vld [vmem:[#allocation6 + $0x30] sm:$0xf0]  ;;  %v2437_v62 = vor.u32 %v3354_v49, %v2434_v50 }
  0x3f   :  { %1359 = vmatpush.bf16.msrb.mxu1 %v3009_v0  ;;  %v2993_v13 = vor.u32 %v3496_v5, %v2992_v4  ;;  %v2848_v15 = vld [vmem:[#allocation6 + $0x480] sm:$0xf]  ;;  %v3460_v16 = vld [vmem:[#allocation6 + $0x48c] sm:$0xf0]  ;;  %v3350_v0 = vld [vmem:[#allocation6 + $0x124] sm:$0xf] }
  0x40   :  { %1397 = vmatpush.bf16.msra.mxu2 %v2517_v60  ;;  %v2976_v17 = vld [vmem:[#allocation6 + $0x580] sm:$0xf]  ;;  %1314 = vmatmul.bf16.vlgmr.msra.gmra.mxu1 %v3790_v8  ;;  %v3492_v18 = vld [vmem:[#allocation6 + $0x58c] sm:$0xf0]  ;;  %v2849_v22 = vor.u32 %v3460_v16, %v2848_v15  ;;  %v3318_v60 = vld [vmem:[#allocation6 + $0x24] sm:$0xf] }
  0x41   :  { %1385 = vmatpush.bf16.msrb.mxu3 %v2373_v1  ;;  %v2977_v25 = vor.u32 %v3492_v18, %v2976_v17  ;;  %v2832_v27 = vld [vmem:[#allocation6 + $0x460] sm:$0xf]  ;;  %v3456_v28 = vld [vmem:[#allocation6 + $0x46c] sm:$0xf0]  ;;  %v2418_v1 = vld [vmem:[#allocation6 + $0x130] sm:$0xf0]  ;;  %v2293_v4 = vor.u32 %v3318_v60, %v2290_v61 }
  0x42   :  { %1347 = vmatpush.bf16.msrb.mxu0 %v2865_v10  ;;  %v2960_v29 = vld [vmem:[#allocation6 + $0x560] sm:$0xf]  ;;  %v3488_v30 = vld [vmem:[#allocation6 + $0x56c] sm:$0xf0]  ;;  %v2833_v35 = vor.u32 %v3456_v28, %v2832_v27  ;;  %v2274_v10 = vld [vmem:[#allocation6 + $0x10] sm:$0xf0]  ;;  %v2421_v15 = vor.u32 %v3350_v0, %v2418_v1 }
  0x43   :  { %1360 = vmatpush.bf16.msrb.mxu1 %v2993_v13  ;;  %v2961_v38 = vor.u32 %v3488_v30, %v2960_v29  ;;  %v2816_v40 = vld [vmem:[#allocation6 + $0x440] sm:$0xf]  ;;  %v3452_v41 = vld [vmem:[#allocation6 + $0x44c] sm:$0xf0]  ;;  %v3406_v11 = vld [vmem:[#allocation6 + $0x2e4] sm:$0xf] }
  0x44   :  { %1398 = vmatpush.bf16.msra.mxu2 %v2501_v9  ;;  %v2944_v42 = vld [vmem:[#allocation6 + $0x540] sm:$0xf]  ;;  %v3484_v43 = vld [vmem:[#allocation6 + $0x54c] sm:$0xf0]  ;;  %v2817_v48 = vor.u32 %v3452_v41, %v2816_v40  ;;  %v3314_v9 = vld [vmem:[#allocation6 + $0x4] sm:$0xf] }
  0x45   :  { %1386 = vmatpush.bf16.msrb.mxu3 %v2357_v14  ;;  %v2945_v51 = vor.u32 %v3484_v43, %v2944_v42  ;;  %v2800_v54 = vld [vmem:[#allocation6 + $0x420] sm:$0xf]  ;;  %v3448_v55 = vld [vmem:[#allocation6 + $0x42c] sm:$0xf0]  ;;  %v2642_v12 = vld [vmem:[#allocation6 + $0x2f0] sm:$0xf0] }
  0x46   :  { %1348 = vmatpush.bf16.msrb.mxu0 %v2849_v22  ;;  %v2928_v57 = vld [vmem:[#allocation6 + $0x520] sm:$0xf]  ;;  %v3480_v59 = vld [vmem:[#allocation6 + $0x52c] sm:$0xf0]  ;;  %v2801_v63 = vor.u32 %v3448_v55, %v2800_v54  ;;  %v3438_v13 = vld [vmem:[#allocation6 + $0x3e4] sm:$0xf] }
  0x47   :  { %1361 = vmatpush.bf16.msrb.mxu1 %v2977_v25  ;;  %v2784_v2 = vld [vmem:[#allocation6 + $0x400] sm:$0xf]  ;;  %v2929_v3 = vor.u32 %v3480_v59, %v2928_v57  ;;  %v3444_v5 = vld [vmem:[#allocation6 + $0x40c] sm:$0xf0]  ;;  %v2770_v14 = vld [vmem:[#allocation6 + $0x3f0] sm:$0xf0]  ;;  %v2645_v25 = vor.u32 %v3406_v11, %v2642_v12 }
  0x48   :  { %1399 = vmatpush.bf16.msra.mxu2 %v2485_v21  ;;  %v2912_v6 = vld [vmem:[#allocation6 + $0x500] sm:$0xf]  ;;  %v3476_v7 = vld [vmem:[#allocation6 + $0x50c] sm:$0xf0]  ;;  %v2785_v16 = vor.u32 %v3444_v5, %v2784_v2  ;;  %v3470_v17 = vld [vmem:[#allocation6 + $0x4e4] sm:$0xf]  ;;  %v2277_v21 = vor.u32 %v3314_v9, %v2274_v10 }
  0x49   :  { %1387 = vmatpush.bf16.msrb.mxu3 %v2341_v26  ;;  %v2898_v18 = vld [vmem:[#allocation6 + $0x4f0] sm:$0xf0]  ;;  %v93_v19 = vld [vmem:[#allocation3 + $0x20] sm:$0xff]  ;;  %v2913_v20 = vor.u32 %v3476_v7, %v2912_v6  ;;  %v3346_v22 = vld [vmem:[#allocation6 + $0x104] sm:$0xf]  ;;  %v2773_v26 = vor.u32 %v3438_v13, %v2770_v14 }
  0x4a   :  { %1349 = vmatpush.bf16.msrb.mxu0 %v2833_v35  ;;  %v2402_v23 = vld [vmem:[#allocation6 + $0x110] sm:$0xf0]  ;;  %v3502_v27 = vld [vmem:[#allocation6 + $0x5e4] sm:$0xf]  ;;  %v2901_v30 = vor.u32 %v3470_v17, %v2898_v18  ;;  %v3798_v31 = vpack.c.bf16 %v93_v19, %v93_v19 }
  0x4b   :  { %1362 = vmatpush.bf16.msrb.mxu1 %v2961_v38  ;;  %3054 = vmatmul.msk.bf16.vlgmr.msrb.gmra.mxu2 %vm1289_vm0, %v3794_v46  ;;  %v94_v24 = vld [vmem:[#allocation3 + $0x28] sm:$0xff]  ;;  %v3402_v29 = vld [vmem:[#allocation6 + $0x2c4] sm:$0xf]  ;;  %v2405_v35 = vor.u32 %v3346_v22, %v2402_v23 }
  0x4c   :  { %1400 = vmatpush.bf16.msra.mxu2 %v2469_v34  ;;  %v3026_v28 = vld [vmem:[#allocation6 + $0x5f0] sm:$0xf0]  ;;  %v3434_v33 = vld [vmem:[#allocation6 + $0x3c4] sm:$0xf]  ;;  %v3800_v36 = vpack.c.bf16 %v94_v24, %v94_v24 }
  0x4d   :  { %1388 = vmatpush.bf16.msrb.mxu3 %v2325_v39  ;;  %v2626_v32 = vld [vmem:[#allocation6 + $0x2d0] sm:$0xf0]  ;;  %v3466_v37 = vld [vmem:[#allocation6 + $0x4c4] sm:$0xf]  ;;  %v3029_v39 = vor.u32 %v3502_v27, %v3026_v28 }
  0x4e   :  { %1350 = vmatpush.bf16.msrb.mxu0 %v2817_v48  ;;  %v2754_v34 = vld [vmem:[#allocation6 + $0x3d0] sm:$0xf0]  ;;  %v2629_v40 = vor.u32 %v3402_v29, %v2626_v32  ;;  %v3498_v42 = vld [vmem:[#allocation6 + $0x5c4] sm:$0xf] }
  0x4f   :  { %1363 = vmatpush.bf16.msrb.mxu1 %v2945_v51  ;;  %v2882_v38 = vld [vmem:[#allocation6 + $0x4d0] sm:$0xf0]  ;;  %v2757_v41 = vor.u32 %v3434_v33, %v2754_v34  ;;  %v3398_v44 = vld [vmem:[#allocation6 + $0x2a4] sm:$0xf] }
  0x50   :  { %1401 = vmatpush.bf16.msra.mxu2 %v2453_v47  ;;  %v3010_v43 = vld [vmem:[#allocation6 + $0x5d0] sm:$0xf0]  ;;  %v2885_v45 = vor.u32 %v3466_v37, %v2882_v38  ;;  %v3430_v48 = vld [vmem:[#allocation6 + $0x3a4] sm:$0xf] }
  0x51   :  { %1389 = vmatpush.bf16.msrb.mxu3 %v2309_v53  ;;  %v2610_v47 = vld [vmem:[#allocation6 + $0x2b0] sm:$0xf0]  ;;  %v3462_v50 = vld [vmem:[#allocation6 + $0x4a4] sm:$0xf]  ;;  %v3013_v53 = vor.u32 %v3498_v42, %v3010_v43 }
  0x52   :  { %1351 = vmatpush.bf16.msrb.mxu0 %v2801_v63  ;;  %v2738_v49 = vld [vmem:[#allocation6 + $0x3b0] sm:$0xf0]  ;;  %v2613_v54 = vor.u32 %v3398_v44, %v2610_v47  ;;  %v3494_v57 = vld [vmem:[#allocation6 + $0x5a4] sm:$0xf] }
  0x53   :  { %1364 = vmatpush.bf16.msrb.mxu1 %v2929_v3  ;;  %v2866_v51 = vld [vmem:[#allocation6 + $0x4b0] sm:$0xf0]  ;;  %v2741_v55 = vor.u32 %v3430_v48, %v2738_v49  ;;  %v3394_v60 = vld [vmem:[#allocation6 + $0x284] sm:$0xf] }
  0x54   :  { %1402 = vmatpush.bf16.msra.mxu2 %v2437_v62  ;;  %v2994_v59 = vld [vmem:[#allocation6 + $0x5b0] sm:$0xf0]  ;;  %v2869_v61 = vor.u32 %v3462_v50, %v2866_v51  ;;  %v3426_v63 = vld [vmem:[#allocation6 + $0x384] sm:$0xf] }
  0x55   :  { %1390 = vmatpush.bf16.msrb.mxu3 %v2293_v4  ;;  %v2594_v62 = vld [vmem:[#allocation6 + $0x290] sm:$0xf0]  ;;  %v3458_v1 = vld [vmem:[#allocation6 + $0x484] sm:$0xf]  ;;  %v2997_v3 = vor.u32 %v3494_v57, %v2994_v59  ;;  %v2392_v57 = vld [vmem:[#allocation6 + $0xe8] sm:$0xf] }
  0x56   :  { %1352 = vmatpush.bf16.msrb.mxu0 %v2785_v16  ;;  %v2722_v0 = vld [vmem:[#allocation6 + $0x390] sm:$0xf0]  ;;  %v2597_v4 = vor.u32 %v3394_v60, %v2594_v62  ;;  %v3490_v6 = vld [vmem:[#allocation6 + $0x584] sm:$0xf]  ;;  %v3345_v59 = vld [vmem:[#allocation6 + $0xf4] sm:$0xf0] }
  0x57   :  { %1365 = vmatpush.bf16.msrb.mxu1 %v2913_v20  ;;  %v2850_v2 = vld [vmem:[#allocation6 + $0x490] sm:$0xf0]  ;;  %v2725_v5 = vor.u32 %v3426_v63, %v2722_v0  ;;  %v3390_v9 = vld [vmem:[#allocation6 + $0x264] sm:$0xf]  ;;  %v2520_v60 = vld [vmem:[#allocation6 + $0x1e8] sm:$0xf] }
  0x58   :  { %1403 = vmatpush.bf16.msra.mxu2 %v2421_v15  ;;  %v2978_v7 = vld [vmem:[#allocation6 + $0x590] sm:$0xf0]  ;;  %v2853_v10 = vor.u32 %v3458_v1, %v2850_v2  ;;  %v3422_v12 = vld [vmem:[#allocation6 + $0x364] sm:$0xf]  ;;  %v3377_v62 = vld [vmem:[#allocation6 + $0x1f4] sm:$0xf0] }
  0x59   :  { %1391 = vmatpush.bf16.msrb.mxu3 %v2277_v21  ;;  %1353 = vmatmul.bf16.vlgmr.msrb.gmra.mxu0 %v3798_v31  ;;  %v2578_v11 = vld [vmem:[#allocation6 + $0x270] sm:$0xf0]  ;;  %v3454_v14 = vld [vmem:[#allocation6 + $0x464] sm:$0xf]  ;;  %v2981_v16 = vor.u32 %v3490_v6, %v2978_v7  ;;  %v2393_v7 = vor.u32 %v3345_v59, %v2392_v57  ;;  %v3329_v57 = vld [vmem:[#allocation6 + $0x74] sm:$0xf0] }
  0x5a   :  { %1410 = vmatpush.bf16.msra.mxu0 %v2645_v25  ;;  %1366 = vmatmul.bf16.vlgmr.msrb.gmra.mxu1 %v3800_v36  ;;  %v2706_v13 = vld [vmem:[#allocation6 + $0x370] sm:$0xf0]  ;;  %v2581_v17 = vor.u32 %v3390_v9, %v2578_v11  ;;  %v3486_v19 = vld [vmem:[#allocation6 + $0x564] sm:$0xf]  ;;  %v3409_v9 = vld [vmem:[#allocation6 + $0x2f4] sm:$0xf0] }
  0x5b   :  { %1423 = vmatpush.bf16.msra.mxu1 %v2773_v26  ;;  %v2834_v15 = vld [vmem:[#allocation6 + $0x470] sm:$0xf0]  ;;  %v2709_v18 = vor.u32 %v3422_v12, %v2706_v13  ;;  %v3386_v21 = vld [vmem:[#allocation6 + $0x244] sm:$0xf]  ;;  %v3441_v11 = vld [vmem:[#allocation6 + $0x3f4] sm:$0xf0]  ;;  %v2521_v12 = vor.u32 %v3377_v62, %v2520_v60 }
  0x5c   :  { %1404 = vmatpush.bf16.msra.mxu2 %v2405_v35  ;;  %1392 = vmatmul.bf16.vlgmr.msrb.gmra.mxu3 %v3784_v56  ;;  %v2962_v20 = vld [vmem:[#allocation6 + $0x570] sm:$0xf0]  ;;  %v2837_v22 = vor.u32 %v3454_v14, %v2834_v15  ;;  %v3418_v24 = vld [vmem:[#allocation6 + $0x344] sm:$0xf]  ;;  %v2376_v14 = vld [vmem:[#allocation6 + $0xc8] sm:$0xf] }
  0x5d   :  { %1436 = vmatpush.bf16.msra.mxu3 %v2901_v30  ;;  %v2562_v23 = vld [vmem:[#allocation6 + $0x250] sm:$0xf0]  ;;  %v3450_v26 = vld [vmem:[#allocation6 + $0x444] sm:$0xf]  ;;  %v2965_v28 = vor.u32 %v3486_v19, %v2962_v20  ;;  %v3341_v15 = vld [vmem:[#allocation6 + $0xd4] sm:$0xf0] }
  0x5e   :  { %1411 = vmatpush.bf16.msra.mxu0 %v2629_v40  ;;  %v2690_v25 = vld [vmem:[#allocation6 + $0x350] sm:$0xf0]  ;;  %v2565_v29 = vor.u32 %v3386_v21, %v2562_v23  ;;  %v3482_v32 = vld [vmem:[#allocation6 + $0x544] sm:$0xf]  ;;  %v2632_v21 = vld [vmem:[#allocation6 + $0x2c8] sm:$0xf] }
  0x5f   :  { %1424 = vmatpush.bf16.msra.mxu1 %v2757_v41  ;;  %1405 = vmatmul.bf16.vlgmr.msra.gmra.mxu2 %v3790_v8  ;;  %v2818_v27 = vld [vmem:[#allocation6 + $0x450] sm:$0xf0]  ;;  %v2693_v30 = vor.u32 %v3418_v24, %v2690_v25  ;;  %v3382_v34 = vld [vmem:[#allocation6 + $0x224] sm:$0xf]  ;;  %v3405_v23 = vld [vmem:[#allocation6 + $0x2d4] sm:$0xf0] }
  0x60   :  { %1449 = vmatpush.bf16.msrb.mxu2 %v3029_v39  ;;  %v2946_v33 = vld [vmem:[#allocation6 + $0x550] sm:$0xf0]  ;;  %v2821_v35 = vor.u32 %v3450_v26, %v2818_v27  ;;  %v3414_v38 = vld [vmem:[#allocation6 + $0x324] sm:$0xf]  ;;  %v2760_v24 = vld [vmem:[#allocation6 + $0x3c8] sm:$0xf] }
  0x61   :  { %1437 = vmatpush.bf16.msra.mxu3 %v2885_v45  ;;  %v2546_v37 = vld [vmem:[#allocation6 + $0x230] sm:$0xf0]  ;;  %v3446_v40 = vld [vmem:[#allocation6 + $0x424] sm:$0xf]  ;;  %v2949_v42 = vor.u32 %v3482_v32, %v2946_v33  ;;  %v3437_v25 = vld [vmem:[#allocation6 + $0x3d4] sm:$0xf0]  ;;  %v2633_v32 = vor.u32 %v3405_v23, %v2632_v21 }
  0x62   :  { %1412 = vmatpush.bf16.msra.mxu0 %v2613_v54  ;;  %v2674_v39 = vld [vmem:[#allocation6 + $0x330] sm:$0xf0]  ;;  %v3478_v43 = vld [vmem:[#allocation6 + $0x524] sm:$0xf]  ;;  %v2549_v45 = vor.u32 %v3382_v34, %v2546_v37  ;;  %v2360_v27 = vld [vmem:[#allocation6 + $0xa8] sm:$0xf]  ;;  %v2761_v33 = vor.u32 %v3437_v25, %v2760_v24 }
  0x63   :  { %1425 = vmatpush.bf16.msra.mxu1 %v2741_v55  ;;  %v2802_v41 = vld [vmem:[#allocation6 + $0x430] sm:$0xf0]  ;;  %v2677_v47 = vor.u32 %v3414_v38, %v2674_v39  ;;  %v3378_v48 = vld [vmem:[#allocation6 + $0x204] sm:$0xf]  ;;  %v2616_v34 = vld [vmem:[#allocation6 + $0x2a8] sm:$0xf] }
  0x64   :  { %1450 = vmatpush.bf16.msrb.mxu2 %v3013_v53  ;;  %v2930_v44 = vld [vmem:[#allocation6 + $0x530] sm:$0xf0]  ;;  %v3410_v50 = vld [vmem:[#allocation6 + $0x304] sm:$0xf]  ;;  %v2805_v51 = vor.u32 %v3446_v40, %v2802_v41  ;;  %v3401_v37 = vld [vmem:[#allocation6 + $0x2b4] sm:$0xf0] }
  0x65   :  { %1438 = vmatpush.bf16.msra.mxu3 %v2869_v61  ;;  %v2530_v49 = vld [vmem:[#allocation6 + $0x210] sm:$0xf0]  ;;  %v3442_v54 = vld [vmem:[#allocation6 + $0x404] sm:$0xf]  ;;  %v2933_v61 = vor.u32 %v3478_v43, %v2930_v44  ;;  %v2744_v38 = vld [vmem:[#allocation6 + $0x3a8] sm:$0xf] }
  0x66   :  { %1413 = vmatpush.bf16.msra.mxu0 %v2597_v4  ;;  %v2658_v53 = vld [vmem:[#allocation6 + $0x310] sm:$0xf0]  ;;  %v3506_v63 = vld [vmem:[#allocation6 + $0x604] sm:$0xf]  ;;  %v2533_v1 = vor.u32 %v3378_v48, %v2530_v49  ;;  %v3433_v39 = vld [vmem:[#allocation6 + $0x3b4] sm:$0xf0] }
  0x67   :  { %1426 = vmatpush.bf16.msra.mxu1 %v2725_v5  ;;  %v2786_v55 = vld [vmem:[#allocation6 + $0x410] sm:$0xf0]  ;;  %v2661_v2 = vor.u32 %v3410_v50, %v2658_v53  ;;  %v2648_v5 = vld [vmem:[#allocation6 + $0x2e8] sm:$0xf]  ;;  %v3365_v44 = vld [vmem:[#allocation6 + $0x194] sm:$0xf0] }
  0x68   :  { %1451 = vmatpush.bf16.msrb.mxu2 %v2997_v3  ;;  %v3042_v0 = vld [vmem:[#allocation6 + $0x610] sm:$0xf0]  ;;  %v3474_v3 = vld [vmem:[#allocation6 + $0x504] sm:$0xf]  ;;  %v2789_v6 = vor.u32 %v3442_v54, %v2786_v55  ;;  %v2649_v19 = vor.u32 %v3409_v9, %v2648_v5  ;;  %v2344_v41 = vld [vmem:[#allocation6 + $0x88] sm:$0xf] }
  0x69   :  { %1439 = vmatpush.bf16.msra.mxu3 %v2853_v10  ;;  %v2914_v4 = vld [vmem:[#allocation6 + $0x510] sm:$0xf0]  ;;  %v2776_v10 = vld [vmem:[#allocation6 + $0x3e8] sm:$0xf]  ;;  %v3045_v13 = vor.u32 %v3506_v63, %v3042_v0  ;;  %v3397_v50 = vld [vmem:[#allocation6 + $0x294] sm:$0xf0] }
  0x6a   :  { %1414 = vmatpush.bf16.msra.mxu0 %v2581_v17  ;;  %v2504_v17 = vld [vmem:[#allocation6 + $0x1c8] sm:$0xf]  ;;  %v2777_v20 = vor.u32 %v3441_v11, %v2776_v10  ;;  %v3429_v53 = vld [vmem:[#allocation6 + $0x394] sm:$0xf0] }
  0x6b   :  { %1427 = vmatpush.bf16.msra.mxu1 %v2709_v18  ;;  %v3373_v18 = vld [vmem:[#allocation6 + $0x1d4] sm:$0xf0]  ;;  %v2472_v43 = vld [vmem:[#allocation6 + $0x188] sm:$0xf] }
  0x6c   :  { %1452 = vmatpush.bf16.msrb.mxu2 %v2981_v16  ;;  %v2917_v16 = vor.u32 %v3474_v3, %v2914_v4  ;;  %v2505_v26 = vor.u32 %v3373_v18, %v2504_v17  ;;  %v2600_v48 = vld [vmem:[#allocation6 + $0x288] sm:$0xf]  ;;  %v2473_v54 = vor.u32 %v3365_v44, %v2472_v43  ;;  %v3361_v60 = vld [vmem:[#allocation6 + $0x174] sm:$0xf0] }
  0x6d   :  { %1440 = vmatpush.bf16.msra.mxu3 %v2837_v22  ;;  %v2377_v22 = vor.u32 %v3341_v15, %v2376_v14  ;;  %v2328_v55 = vld [vmem:[#allocation6 + $0x68] sm:$0xf]  ;;  %v3425_v3 = vld [vmem:[#allocation6 + $0x374] sm:$0xf0] }
  0x6e   :  { %1415 = vmatpush.bf16.msra.mxu0 %v2565_v29  ;;  %v2488_v29 = vld [vmem:[#allocation6 + $0x1a8] sm:$0xf]  ;;  %v2329_v0 = vor.u32 %v3329_v57, %v2328_v55  ;;  %v3357_v9 = vld [vmem:[#allocation6 + $0x154] sm:$0xf0] }
  0x6f   :  { %1428 = vmatpush.bf16.msra.mxu1 %v2693_v30  ;;  %v3369_v30 = vld [vmem:[#allocation6 + $0x1b4] sm:$0xf0]  ;;  %v2456_v59 = vld [vmem:[#allocation6 + $0x168] sm:$0xf] }
  0x70   :  { %1453 = vmatpush.bf16.msrb.mxu2 %v2965_v28  ;;  %v3337_v28 = vld [vmem:[#allocation6 + $0xb4] sm:$0xf0]  ;;  %v2489_v40 = vor.u32 %v3369_v30, %v2488_v29  ;;  %v2584_v63 = vld [vmem:[#allocation6 + $0x268] sm:$0xf]  ;;  %v2457_v4 = vor.u32 %v3361_v60, %v2456_v59 }
  0x71   :  { %1441 = vmatpush.bf16.msra.mxu3 %v2821_v35  ;;  %v2361_v35 = vor.u32 %v3337_v28, %v2360_v27  ;;  %v2312_v5 = vld [vmem:[#allocation6 + $0x48] sm:$0xf]  ;;  %v3389_v14 = vld [vmem:[#allocation6 + $0x254] sm:$0xf0] }
  0x72   :  { %1416 = vmatpush.bf16.msra.mxu0 %v2549_v45  ;;  %v2617_v45 = vor.u32 %v3401_v37, %v2616_v34  ;;  %v2696_v15 = vld [vmem:[#allocation6 + $0x348] sm:$0xf]  ;;  %v3353_v21 = vld [vmem:[#allocation6 + $0x134] sm:$0xf0] }
  0x73   :  { %1429 = vmatpush.bf16.msra.mxu1 %v2677_v47  ;;  %v2745_v47 = vor.u32 %v3433_v39, %v2744_v38  ;;  %v2296_v18 = vld [vmem:[#allocation6 + $0x28] sm:$0xf]  ;;  %v3385_v25 = vld [vmem:[#allocation6 + $0x234] sm:$0xf0] }
  0x74   :  { %1454 = vmatpush.bf16.msrb.mxu2 %v2949_v42  ;;  %v3333_v42 = vld [vmem:[#allocation6 + $0x94] sm:$0xf0]  ;;  %v2552_v24 = vld [vmem:[#allocation6 + $0x228] sm:$0xf] }
  0x75   :  { %1442 = vmatpush.bf16.msra.mxu3 %v2805_v51  ;;  %v2345_v49 = vor.u32 %v3333_v42, %v2344_v41  ;;  %v2728_v51 = vld [vmem:[#allocation6 + $0x388] sm:$0xf]  ;;  %v3417_v28 = vld [vmem:[#allocation6 + $0x334] sm:$0xf0]  ;;  %v2553_v39 = vor.u32 %v3385_v25, %v2552_v24 }
  0x76   :  { %1417 = vmatpush.bf16.msra.mxu0 %v2533_v1  ;;  %v2729_v62 = vor.u32 %v3429_v53, %v2728_v51  ;;  %v3393_v1 = vld [vmem:[#allocation6 + $0x274] sm:$0xf0]  ;;  %v2680_v27 = vld [vmem:[#allocation6 + $0x328] sm:$0xf]  ;;  %v2394_v51 = vld [vmem:[#allocation6 + $0xf8] sm:$0xf0] }
  0x77   :  { %1430 = vmatpush.bf16.msra.mxu1 %v2661_v2  ;;  %v2712_v2 = vld [vmem:[#allocation6 + $0x368] sm:$0xf]  ;;  %v2585_v10 = vor.u32 %v3393_v1, %v2584_v63  ;;  %v3349_v34 = vld [vmem:[#allocation6 + $0x114] sm:$0xf0] }
  0x78   :  { %1455 = vmatpush.bf16.msrb.mxu2 %v2933_v61  ;;  %v2601_v61 = vor.u32 %v3397_v50, %v2600_v48  ;;  %v2713_v11 = vor.u32 %v3425_v3, %v2712_v2  ;;  %v2280_v29 = vld [vmem:[#allocation6 + $0x8] sm:$0xf]  ;;  %v3473_v37 = vld [vmem:[#allocation6 + $0x4f4] sm:$0xf0]  ;;  %v3343_v48 = vld [vmem:[#allocation6 + $0xec] sm:$0xf] }
  0x79   :  { %1443 = vmatpush.bf16.msra.mxu3 %v2789_v6  ;;  %1418 = vmatmul.bf16.vlgmr.msra.gmra.mxu0 %v3782_v52  ;;  %v3325_v6 = vld [vmem:[#allocation6 + $0x54] sm:$0xf0]  ;;  %v3032_v38 = vld [vmem:[#allocation6 + $0x5e8] sm:$0xf]  ;;  %v3375_v2 = vld [vmem:[#allocation6 + $0x1ec] sm:$0xf] }
  0x7a   :  { %1469 = vmatpush.bf16.msrb.mxu0 %v3045_v13  ;;  %1431 = vmatmul.bf16.vlgmr.msra.gmra.mxu1 %v3786_v58  ;;  %v2313_v13 = vor.u32 %v3325_v6, %v2312_v5  ;;  %v3505_v41 = vld [vmem:[#allocation6 + $0x5f4] sm:$0xf0]  ;;  %v2536_v42 = vld [vmem:[#allocation6 + $0x208] sm:$0xf]  ;;  %v2522_v3 = vld [vmem:[#allocation6 + $0x1f8] sm:$0xf0] }
  0x7b   :  { %1475 = vmatpush.bf16.msrb.mxu1 %v2393_v7  ;;  %v2440_v7 = vld [vmem:[#allocation6 + $0x148] sm:$0xf]  ;;  %v3381_v43 = vld [vmem:[#allocation6 + $0x214] sm:$0xf0]  ;;  %v3033_v55 = vor.u32 %v3505_v41, %v3032_v38  ;;  %v3339_v5 = vld [vmem:[#allocation6 + $0xcc] sm:$0xf] }
  0x7c   :  { %1456 = vmatpush.bf16.msrb.mxu2 %v2917_v16  ;;  %1444 = vmatmul.bf16.vlgmr.msra.gmra.mxu3 %v3798_v31  ;;  %v3421_v16 = vld [vmem:[#allocation6 + $0x354] sm:$0xf0]  ;;  %v2441_v17 = vor.u32 %v3357_v9, %v2440_v7  ;;  %v3048_v53 = vld [vmem:[#allocation6 + $0x608] sm:$0xf]  ;;  %v2537_v60 = vor.u32 %v3381_v43, %v2536_v42  ;;  %v2378_v6 = vld [vmem:[#allocation6 + $0xd8] sm:$0xf0] }
  0x7d   :  { %1488 = vmatpush.bf16.msrb.mxu3 %v2521_v12  ;;  %v2568_v12 = vld [vmem:[#allocation6 + $0x248] sm:$0xf]  ;;  %v2697_v23 = vor.u32 %v3421_v16, %v2696_v15  ;;  %v3469_v59 = vld [vmem:[#allocation6 + $0x4d4] sm:$0xf0]  ;;  %v3371_v15 = vld [vmem:[#allocation6 + $0x1cc] sm:$0xf] }
  0x7e   :  { %1501 = vmatpush.bf16.msra.mxu0 %v2649_v19  ;;  %v3321_v19 = vld [vmem:[#allocation6 + $0x34] sm:$0xf0]  ;;  %v2888_v57 = vld [vmem:[#allocation6 + $0x4c8] sm:$0xf]  ;;  %v2506_v16 = vld [vmem:[#allocation6 + $0x1d8] sm:$0xf0] }
  0x7f   :  { %1476 = vmatpush.bf16.msrb.mxu1 %v2377_v22  ;;  %1457 = vmatmul.bf16.vlgmr.msrb.gmra.mxu2 %v3800_v36  ;;  %v2569_v22 = vor.u32 %v3389_v14, %v2568_v12  ;;  %v3501_v63 = vld [vmem:[#allocation6 + $0x5d4] sm:$0xf0]  ;;  %v2872_v9 = vld [vmem:[#allocation6 + $0x4a8] sm:$0xf]  ;;  %v2381_v14 = vor.u32 %v3339_v5, %v2378_v6  ;;  %v3363_v41 = vld [vmem:[#allocation6 + $0x18c] sm:$0xf] }
  0x80   :  { %1514 = vmatpush.bf16.msra.mxu2 %v2777_v20  ;;  %v2424_v20 = vld [vmem:[#allocation6 + $0x128] sm:$0xf]  ;;  %v3493_v25 = vld [vmem:[#allocation6 + $0x594] sm:$0xf0]  ;;  %v2474_v42 = vld [vmem:[#allocation6 + $0x198] sm:$0xf0] }
  0x81   :  { %1489 = vmatpush.bf16.msrb.mxu3 %v2505_v26  ;;  %v2297_v26 = vor.u32 %v3321_v19, %v2296_v18  ;;  %v2425_v30 = vor.u32 %v3353_v21, %v2424_v20  ;;  %v3000_v12 = vld [vmem:[#allocation6 + $0x5a8] sm:$0xf]  ;;  %v3335_v18 = vld [vmem:[#allocation6 + $0xac] sm:$0xf]  ;;  %v2362_v19 = vld [vmem:[#allocation6 + $0xb8] sm:$0xf0] }
  0x82   :  { %1502 = vmatpush.bf16.msra.mxu0 %v2633_v32  ;;  %v3317_v32 = vld [vmem:[#allocation6 + $0x14] sm:$0xf0]  ;;  %v2856_v21 = vld [vmem:[#allocation6 + $0x488] sm:$0xf]  ;;  %v3355_v5 = vld [vmem:[#allocation6 + $0x14c] sm:$0xf] }
  0x83   :  { %1477 = vmatpush.bf16.msrb.mxu1 %v2361_v35  ;;  %v2904_v35 = vld [vmem:[#allocation6 + $0x4e8] sm:$0xf]  ;;  %v2281_v44 = vor.u32 %v3317_v32, %v2280_v29  ;;  %v2346_v32 = vld [vmem:[#allocation6 + $0x98] sm:$0xf0] }
  0x84   :  { %1515 = vmatpush.bf16.msra.mxu2 %v2761_v33  ;;  %v2408_v33 = vld [vmem:[#allocation6 + $0x108] sm:$0xf]  ;;  %v2905_v50 = vor.u32 %v3473_v37, %v2904_v35  ;;  %v3457_v35 = vld [vmem:[#allocation6 + $0x474] sm:$0xf0]  ;;  %v2442_v6 = vld [vmem:[#allocation6 + $0x158] sm:$0xf0] }
  0x85   :  { %1490 = vmatpush.bf16.msrb.mxu3 %v2489_v40  ;;  %v2681_v40 = vor.u32 %v3417_v28, %v2680_v27  ;;  %v2984_v24 = vld [vmem:[#allocation6 + $0x588] sm:$0xf]  ;;  %v3367_v27 = vld [vmem:[#allocation6 + $0x1ac] sm:$0xf]  ;;  %v2490_v28 = vld [vmem:[#allocation6 + $0x1b8] sm:$0xf0] }
  0x86   :  { %1503 = vmatpush.bf16.msra.mxu0 %v2617_v45  ;;  %v2664_v45 = vld [vmem:[#allocation6 + $0x308] sm:$0xf]  ;;  %v2493_v37 = vor.u32 %v3367_v27, %v2490_v28 }
  0x87   :  { %1478 = vmatpush.bf16.msrb.mxu1 %v2345_v49  ;;  %v2409_v49 = vor.u32 %v3349_v34, %v2408_v33  ;;  %v2985_v33 = vor.u32 %v3493_v25, %v2984_v24  ;;  %v2840_v34 = vld [vmem:[#allocation6 + $0x468] sm:$0xf]  ;;  %v3315_v25 = vld [vmem:[#allocation6 + $0xc] sm:$0xf] }
  0x88   :  { %1516 = vmatpush.bf16.msra.mxu2 %v2745_v47  ;;  %v3413_v47 = vld [vmem:[#allocation6 + $0x314] sm:$0xf0]  ;;  %v2968_v38 = vld [vmem:[#allocation6 + $0x568] sm:$0xf]  ;;  %v2841_v43 = vor.u32 %v3457_v35, %v2840_v34  ;;  %v3403_v34 = vld [vmem:[#allocation6 + $0x2cc] sm:$0xf] }
  0x89   :  { %1491 = vmatpush.bf16.msrb.mxu3 %v2473_v54  ;;  %3055 = vmatmul.msk.bf16.vlgmr.msrb.gmra.mxu0 %vm1289_vm0, %v3794_v46  ;;  %v3509_v54 = vld [vmem:[#allocation6 + $0x614] sm:$0xf0]  ;;  %v2634_v35 = vld [vmem:[#allocation6 + $0x2d8] sm:$0xf0] }
  0x8a   :  { %1504 = vmatpush.bf16.msra.mxu0 %v2601_v61  ;;  %v2665_v61 = vor.u32 %v3413_v47, %v2664_v45  ;;  %v3049_v1 = vor.u32 %v3509_v54, %v3048_v53  ;;  %v2330_v45 = vld [vmem:[#allocation6 + $0x78] sm:$0xf0]  ;;  %v3485_v53 = vld [vmem:[#allocation6 + $0x554] sm:$0xf0] }
  0x8b   :  { %1479 = vmatpush.bf16.msrb.mxu1 %v2329_v0  ;;  %v2397_v0 = vor.u32 %v3343_v48, %v2394_v51  ;;  %v2824_v48 = vld [vmem:[#allocation6 + $0x448] sm:$0xf] }
  0x8c   :  { %1517 = vmatpush.bf16.msra.mxu2 %v2729_v62  ;;  %v3016_v62 = vld [vmem:[#allocation6 + $0x5c8] sm:$0xf] }
  0x8d   :  { %1492 = vmatpush.bf16.msrb.mxu3 %v2457_v4  ;;  %v2889_v4 = vor.u32 %v3469_v59, %v2888_v57  ;;  %v3017_v7 = vor.u32 %v3501_v63, %v3016_v62  ;;  %v2952_v51 = vld [vmem:[#allocation6 + $0x548] sm:$0xf]  ;;  %v2458_v57 = vld [vmem:[#allocation6 + $0x178] sm:$0xf0] }
  0x8e   :  { %1505 = vmatpush.bf16.msra.mxu0 %v2585_v10  ;;  %v3465_v10 = vld [vmem:[#allocation6 + $0x4b4] sm:$0xf0]  ;;  %v2953_v62 = vor.u32 %v3485_v53, %v2952_v51  ;;  %v2808_v63 = vld [vmem:[#allocation6 + $0x428] sm:$0xf]  ;;  %v3399_v51 = vld [vmem:[#allocation6 + $0x2ac] sm:$0xf] }
  0x8f   :  { %1480 = vmatpush.bf16.msrb.mxu1 %v2313_v13  ;;  %v3497_v13 = vld [vmem:[#allocation6 + $0x5b4] sm:$0xf0]  ;;  %v2618_v53 = vld [vmem:[#allocation6 + $0x2b8] sm:$0xf0] }
  0x90   :  { %1518 = vmatpush.bf16.msra.mxu2 %v2713_v11  ;;  %v2525_v11 = vor.u32 %v3375_v2, %v2522_v3  ;;  %v3001_v20 = vor.u32 %v3497_v13, %v3000_v12  ;;  %v2936_v2 = vld [vmem:[#allocation6 + $0x528] sm:$0xf]  ;;  %v3481_v3 = vld [vmem:[#allocation6 + $0x534] sm:$0xf0] }
  0x91   :  { %1493 = vmatpush.bf16.msrb.mxu3 %v2441_v17  ;;  %v2873_v17 = vor.u32 %v3465_v10, %v2872_v9  ;;  %v3319_v9 = vld [vmem:[#allocation6 + $0x2c] sm:$0xf]  ;;  %v2298_v10 = vld [vmem:[#allocation6 + $0x38] sm:$0xf0]  ;;  %v2937_v12 = vor.u32 %v3481_v3, %v2936_v2  ;;  %v3445_v13 = vld [vmem:[#allocation6 + $0x414] sm:$0xf0] }
  0x92   :  { %1506 = vmatpush.bf16.msra.mxu0 %v2569_v22  ;;  %v3461_v22 = vld [vmem:[#allocation6 + $0x494] sm:$0xf0]  ;;  %v3395_v2 = vld [vmem:[#allocation6 + $0x28c] sm:$0xf]  ;;  %v2602_v3 = vld [vmem:[#allocation6 + $0x298] sm:$0xf0] }
  0x93   :  { %1481 = vmatpush.bf16.msrb.mxu1 %v2297_v26  ;;  %v2365_v26 = vor.u32 %v3335_v18, %v2362_v19  ;;  %v2857_v29 = vor.u32 %v3461_v22, %v2856_v21  ;;  %v2650_v18 = vld [vmem:[#allocation6 + $0x2f8] sm:$0xf0]  ;;  %v3439_v19 = vld [vmem:[#allocation6 + $0x3ec] sm:$0xf] }
  0x94   :  { %1519 = vmatpush.bf16.msra.mxu2 %v2697_v23  ;;  %v2509_v23 = vor.u32 %v3371_v15, %v2506_v16  ;;  %v3477_v15 = vld [vmem:[#allocation6 + $0x514] sm:$0xf0]  ;;  %v2445_v16 = vor.u32 %v3355_v5, %v2442_v6  ;;  %v2778_v21 = vld [vmem:[#allocation6 + $0x3f8] sm:$0xf0]  ;;  %v3351_v22 = vld [vmem:[#allocation6 + $0x12c] sm:$0xf] }
  0x95   :  { %1494 = vmatpush.bf16.msrb.mxu3 %v2425_v30  ;;  %v3331_v30 = vld [vmem:[#allocation6 + $0x8c] sm:$0xf]  ;;  %v2730_v6 = vld [vmem:[#allocation6 + $0x398] sm:$0xf0] }
  0x96   :  { %1507 = vmatpush.bf16.msra.mxu0 %v2553_v39  ;;  %v3489_v39 = vld [vmem:[#allocation6 + $0x574] sm:$0xf0]  ;;  %v3427_v5 = vld [vmem:[#allocation6 + $0x38c] sm:$0xf] }
  0x97   :  { %1482 = vmatpush.bf16.msrb.mxu1 %v2281_v44  ;;  %v3327_v44 = vld [vmem:[#allocation6 + $0x6c] sm:$0xf]  ;;  %v2969_v47 = vor.u32 %v3489_v39, %v2968_v38  ;;  %v2762_v39 = vld [vmem:[#allocation6 + $0x3d8] sm:$0xf0] }
  0x98   :  { %1520 = vmatpush.bf16.msra.mxu2 %v2681_v40  ;;  %v2349_v40 = vor.u32 %v3331_v30, %v2346_v32  ;;  %v2333_v54 = vor.u32 %v3327_v44, %v2330_v45  ;;  %v2906_v30 = vld [vmem:[#allocation6 + $0x4f8] sm:$0xf0]  ;;  %v2781_v32 = vor.u32 %v3439_v19, %v2778_v21  ;;  %v2637_v45 = vor.u32 %v3403_v34, %v2634_v35  ;;  %v3491_v21 = vld [vmem:[#allocation6 + $0x58c] sm:$0xf] }
  0x99   :  { %1495 = vmatpush.bf16.msrb.mxu3 %v2409_v49  ;;  %v3453_v49 = vld [vmem:[#allocation6 + $0x454] sm:$0xf0]  ;;  %v3034_v44 = vld [vmem:[#allocation6 + $0x5f8] sm:$0xf0]  ;;  %v3487_v34 = vld [vmem:[#allocation6 + $0x56c] sm:$0xf] }
  0x9a   :  { %1508 = vmatpush.bf16.msra.mxu0 %v2537_v60  ;;  %1483 = vmatmul.bf16.vlgmr.msrb.gmra.mxu1 %v3784_v56  ;;  %v2825_v59 = vor.u32 %v3453_v49, %v2824_v48  ;;  %v3323_v60 = vld [vmem:[#allocation6 + $0x4c] sm:$0xf]  ;;  %v2890_v48 = vld [vmem:[#allocation6 + $0x4d8] sm:$0xf0] }
  0x9b   :  { %1527 = vmatpush.bf16.msra.mxu1 %v2905_v50  ;;  %v2477_v50 = vor.u32 %v3363_v41, %v2474_v42  ;;  %v2410_v41 = vld [vmem:[#allocation6 + $0x118] sm:$0xf0] }
  0x9c   :  { %1521 = vmatpush.bf16.msra.mxu2 %v2665_v61  ;;  %1496 = vmatmul.bf16.vlgmr.msrb.gmra.mxu3 %v3790_v8  ;;  %v2314_v61 = vld [vmem:[#allocation6 + $0x58] sm:$0xf0] }
  0x9d   :  { %1540 = vmatpush.bf16.msra.mxu3 %v3033_v55  ;;  %1509 = vmatmul.bf16.vlgmr.msra.gmra.mxu0 %v3782_v52  ;;  %v3359_v55 = vld [vmem:[#allocation6 + $0x16c] sm:$0xf]  ;;  %v2714_v19 = vld [vmem:[#allocation6 + $0x378] sm:$0xf0] }
  0x9e   :  { %1560 = vmatpush.bf16.msrb.mxu0 %v3049_v1  ;;  %v2461_v1 = vor.u32 %v3359_v55, %v2458_v57  ;;  %v3431_v55 = vld [vmem:[#allocation6 + $0x3ac] sm:$0xf]  ;;  %v2746_v57 = vld [vmem:[#allocation6 + $0x3b8] sm:$0xf0] }
  0x9f   :  { %1528 = vmatpush.bf16.msra.mxu1 %v2889_v4  ;;  %1522 = vmatmul.bf16.vlgmr.msra.gmra.mxu2 %v3786_v58  ;;  %v2317_v4 = vor.u32 %v3323_v60, %v2314_v61  ;;  %v3499_v60 = vld [vmem:[#allocation6 + $0x5cc] sm:$0xf]  ;;  %v3018_v61 = vld [vmem:[#allocation6 + $0x5d8] sm:$0xf0] }
  0xa0   :  { %1566 = vmatpush.bf16.msrb.mxu2 %v2397_v0  ;;  %v3449_v0 = vld [vmem:[#allocation6 + $0x434] sm:$0xf0]  ;;  %v2970_v35 = vld [vmem:[#allocation6 + $0x578] sm:$0xf0] }
  0xa1   :  { %1541 = vmatpush.bf16.msra.mxu3 %v3017_v7  ;;  %v2809_v7 = vor.u32 %v3449_v0, %v2808_v63  ;;  %v3463_v63 = vld [vmem:[#allocation6 + $0x4ac] sm:$0xf]  ;;  %v2874_v0 = vld [vmem:[#allocation6 + $0x4b8] sm:$0xf0] }
  0xa2   :  { %1579 = vmatpush.bf16.msra.mxu0 %v2525_v11  ;;  %v2792_v11 = vld [vmem:[#allocation6 + $0x408] sm:$0xf] }
  0xa3   :  { %1529 = vmatpush.bf16.msra.mxu1 %v2873_v17  ;;  %v3407_v17 = vld [vmem:[#allocation6 + $0x2ec] sm:$0xf]  ;;  %v2793_v24 = vor.u32 %v3445_v13, %v2792_v11  ;;  %v2605_v11 = vor.u32 %v3395_v2, %v2602_v3  ;;  %v2858_v13 = vld [vmem:[#allocation6 + $0x498] sm:$0xf0]  ;;  %v3116_v3 = vld [vmem:[#allocation9 + $0x70] sm:$0xf] }
  0xa4   :  { %1567 = vmatpush.bf16.msrb.mxu2 %v2381_v14  ;;  %v2920_v14 = vld [vmem:[#allocation6 + $0x508] sm:$0xf]  ;;  %v2653_v28 = vor.u32 %v3407_v17, %v2650_v18  ;;  %v3423_v18 = vld [vmem:[#allocation6 + $0x36c] sm:$0xf] }
  0xa5   :  { %1542 = vmatpush.bf16.msra.mxu3 %v3001_v20  ;;  %v2301_v20 = vor.u32 %v3319_v9, %v2298_v10  ;;  %v2921_v27 = vor.u32 %v3477_v15, %v2920_v14  ;;  %v3495_v9 = vld [vmem:[#allocation6 + $0x5ac] sm:$0xf]  ;;  %v3002_v10 = vld [vmem:[#allocation6 + $0x5b8] sm:$0xf0]  ;;  %v2733_v14 = vor.u32 %v3427_v5, %v2730_v6 }
  0xa6   :  { %1580 = vmatpush.bf16.msra.mxu0 %v2509_v23  ;;  %v2426_v23 = vld [vmem:[#allocation6 + $0x138] sm:$0xf0]  ;;  %v3391_v15 = vld [vmem:[#allocation6 + $0x26c] sm:$0xf]  ;;  %v3005_v17 = vor.u32 %v3495_v9, %v3002_v10 }
  0xa7   :  { %1530 = vmatpush.bf16.msra.mxu1 %v2857_v29  ;;  %v3471_v29 = vld [vmem:[#allocation6 + $0x4ec] sm:$0xf]  ;;  %v3050_v6 = vld [vmem:[#allocation6 + $0x618] sm:$0xf0] }
  0xa8   :  { %1568 = vmatpush.bf16.msrb.mxu2 %v2365_v26  ;;  %v2282_v26 = vld [vmem:[#allocation6 + $0x18] sm:$0xf0]  ;;  %v2909_v42 = vor.u32 %v3471_v29, %v2906_v30  ;;  %v3419_v30 = vld [vmem:[#allocation6 + $0x34c] sm:$0xf] }
  0xa9   :  { %1543 = vmatpush.bf16.msra.mxu3 %v2985_v33  ;;  %v2429_v33 = vor.u32 %v3351_v22, %v2426_v23  ;;  %v2285_v38 = vor.u32 %v3315_v25, %v2282_v26  ;;  %v2986_v22 = vld [vmem:[#allocation6 + $0x598] sm:$0xf0]  ;;  %v3387_v26 = vld [vmem:[#allocation6 + $0x24c] sm:$0xf] }
  0xaa   :  { %1581 = vmatpush.bf16.msra.mxu0 %v2493_v37  ;;  %v3435_v37 = vld [vmem:[#allocation6 + $0x3cc] sm:$0xf]  ;;  %v2842_v25 = vld [vmem:[#allocation6 + $0x478] sm:$0xf0] }
  0xab   :  { %1531 = vmatpush.bf16.msra.mxu1 %v2841_v43  ;;  %v3503_v43 = vld [vmem:[#allocation6 + $0x5ec] sm:$0xf]  ;;  %v2765_v49 = vor.u32 %v3435_v37, %v2762_v39  ;;  %v3826_v37 = vld [vmem:[#allocation8] sm:$0xf]  ;;  %v3525_v9 = vld [vmem:[#allocation9 + $0x74] sm:$0xf0] }
  0xac   :  { %1569 = vmatpush.bf16.msrb.mxu2 %v2349_v40  ;;  %v3347_v40 = vld [vmem:[#allocation6 + $0x10c] sm:$0xf] }
  0xad   :  { %1544 = vmatpush.bf16.msra.mxu3 %v2969_v47  ;;  %3056 = vmatmul.msk.bf16.vlgmr.msrb.gmra.mxu0 %vm1289_vm0, %v3794_v46  ;;  %v3467_v47 = vld [vmem:[#allocation6 + $0x4cc] sm:$0xf] }
  0xae   :  { %1582 = vmatpush.bf16.msra.mxu0 %v2477_v50  ;;  %v2413_v50 = vor.u32 %v3347_v40, %v2410_v41  ;;  %v3451_v40 = vld [vmem:[#allocation6 + $0x44c] sm:$0xf]  ;;  %v2826_v41 = vld [vmem:[#allocation6 + $0x458] sm:$0xf0] }
  0xaf   :  { %1532 = vmatpush.bf16.msra.mxu1 %v2825_v59  ;;  %v2893_v59 = vor.u32 %v3467_v47, %v2890_v48  ;;  %v2973_v47 = vor.u32 %v3487_v34, %v2970_v35  ;;  %v3415_v48 = vld [vmem:[#allocation6 + $0x32c] sm:$0xf]  ;;  %v3100_v35 = vld [vmem:[#allocation9 + $0x50] sm:$0xf] }
  0xb0   :  { %1570 = vmatpush.bf16.msrb.mxu2 %v2333_v54  ;;  %v3037_v54 = vor.u32 %v3503_v43, %v3034_v44  ;;  %v3383_v44 = vld [vmem:[#allocation6 + $0x22c] sm:$0xf] }
  0xb1   :  { %1545 = vmatpush.bf16.msra.mxu3 %v2953_v62  ;;  %v2621_v62 = vor.u32 %v3399_v51, %v2618_v53  ;;  %v301_v51 = vperm.slane %v3826_v37, 0  ;;  %v2829_v53 = vor.u32 %v3451_v40, %v2826_v41  ;;  %v3507_v5 = vld [vmem:[#allocation6 + $0x60c] sm:$0xf] }
  0xb2   :  { %1583 = vmatpush.bf16.msra.mxu0 %v2461_v1  ;;  %v2749_v1 = vor.u32 %v3431_v55, %v2746_v57  ;;  %v2954_v55 = vld [vmem:[#allocation6 + $0x558] sm:$0xf0]  ;;  %v3479_v10 = vld [vmem:[#allocation6 + $0x52c] sm:$0xf] }
  0xb3   :  { %1533 = vmatpush.bf16.msra.mxu1 %v2809_v7  ;;  %v2877_v7 = vor.u32 %v3463_v63, %v2874_v0  ;;  %v2538_v63 = vld [vmem:[#allocation6 + $0x218] sm:$0xf0]  ;;  %v3411_v0 = vld [vmem:[#allocation6 + $0x30c] sm:$0xf] }
  0xb4   :  { %1571 = vmatpush.bf16.msrb.mxu2 %v2317_v4  ;;  %v3021_v4 = vor.u32 %v3499_v60, %v3018_v61  ;;  %v2810_v60 = vld [vmem:[#allocation6 + $0x438] sm:$0xf0]  ;;  %v3379_v61 = vld [vmem:[#allocation6 + $0x20c] sm:$0xf] }
  0xb5   :  { %1546 = vmatpush.bf16.msra.mxu3 %v2937_v12  ;;  %v3459_v12 = vld [vmem:[#allocation6 + $0x48c] sm:$0xf] }
  0xb6   :  { %1584 = vmatpush.bf16.msra.mxu0 %v2445_v16  ;;  %v2586_v16 = vld [vmem:[#allocation6 + $0x278] sm:$0xf0] }
  0xb7   :  { %1534 = vmatpush.bf16.msra.mxu1 %v2793_v24  ;;  %v2589_v23 = vor.u32 %v3391_v15, %v2586_v16  ;;  %v3455_v24 = vld [vmem:[#allocation6 + $0x46c] sm:$0xf]  ;;  %v2794_v15 = vld [vmem:[#allocation6 + $0x418] sm:$0xf0] }
  0xb8   :  { %1572 = vmatpush.bf16.msrb.mxu2 %v2301_v20  ;;  %v3822_v20 = vpop.f32.mrf.mxu0 }
  0xb9   :  { %1547 = vmatpush.bf16.msra.mxu3 %v2921_v27  ;;  %v2570_v27 = vld [vmem:[#allocation6 + $0x258] sm:$0xf0] }
  0xba   :  { %1585 = vmatpush.bf16.msra.mxu0 %v2429_v33  ;;  %1535 = vmatmul.bf16.vlgmr.msra.gmra.mxu1 %v3798_v31  ;;  %v2845_v33 = vor.u32 %v3455_v24, %v2842_v25  ;;  %v2573_v39 = vor.u32 %v3387_v26, %v2570_v27  ;;  %v3108_v25 = vld [vmem:[#allocation9 + $0x60] sm:$0xf]  ;;  %v3475_v26 = vld [vmem:[#allocation6 + $0x50c] sm:$0xf]  ;;  %v2922_v27 = vld [vmem:[#allocation6 + $0x518] sm:$0xf0] }
  0xbb   :  { %1592 = vmatpush.bf16.msrb.mxu1 %v2653_v28  ;;  %v2989_v28 = vor.u32 %v3491_v21, %v2986_v22  ;;  %v1303_v21 = vadd.f32 %v3822_v20, %v301_v51  ;;  %v3117_v22 = vor.u32 %v3525_v9, %v3116_v3  ;;  %v2925_v34 = vor.u32 %v3475_v26, %v2922_v27 }
  0xbc   :  { %1573 = vmatpush.bf16.msrb.mxu2 %v2285_v38  ;;  %1548 = vmatmul.bf16.vlgmr.msra.gmra.mxu3 %v3800_v36 }
  0xbd   :  { %1605 = vmatpush.bf16.msrb.mxu3 %v2781_v32  ;;  %v3824_v29 = vpop.f32.mrf.mxu1  ;;  %v2698_v32 = vld [vmem:[#allocation6 + $0x358] sm:$0xf0] }
  0xbe   :  { %1586 = vmatpush.bf16.msra.mxu0 %v2413_v50  ;;  %v3828_v38 = vpop.f32.mrf.mxu2 }
  0xbf   :  { %1593 = vmatpush.bf16.msrb.mxu1 %v2637_v45  ;;  %1574 = vmatmul.bf16.vlgmr.msrb.gmra.mxu2 %v3784_v56  ;;  %v2861_v56 = vor.u32 %v3459_v12, %v2858_v13  ;;  %v2554_v45 = vld [vmem:[#allocation6 + $0x238] sm:$0xf0]  ;;  %v2541_v13 = vor.u32 %v3379_v61, %v2538_v63  ;;  %v3076_v63 = vld [vmem:[#allocation9 + $0x20] sm:$0xf] }
  0xc0   :  { %1618 = vmatpush.bf16.msra.mxu2 %v2909_v42  ;;  %v2701_v42 = vor.u32 %v3419_v30, %v2698_v32  ;;  %v1304_v50 = vpop.f32.mrf.mxu0  ;;  %v2557_v57 = vor.u32 %v3383_v44, %v2554_v45  ;;  %v3172_v30 = vld [vmem:[#allocation9 + $0xe0] sm:$0xf]  ;;  %v3539_v32 = vld [vmem:[#allocation9 + $0xe4] sm:$0xf0]  ;;  %v3537_v44 = vld [vmem:[#allocation9 + $0xd4] sm:$0xf0] }
  0xc1   :  { %1606 = vmatpush.bf16.msrb.mxu3 %v2765_v49  ;;  %1587 = vmatmul.bf16.vlgmr.msra.gmra.mxu0 %v3790_v8  ;;  %v2717_v8 = vor.u32 %v3423_v18, %v2714_v19  ;;  %v3830_v43 = vpop.f32.mrf.mxu3  ;;  %v2682_v49 = vld [vmem:[#allocation6 + $0x338] sm:$0xf0]  ;;  %v3180_v19 = vld [vmem:[#allocation9 + $0xf0] sm:$0xf]  ;;  %v3173_v41 = vor.u32 %v3539_v32, %v3172_v30  ;;  %v3535_v50 = vld [vmem:[#allocation9 + $0xc4] sm:$0xf0] }
  0xc2   :  { %1631 = vmatpush.bf16.msrb.mxu0 %v3037_v54  ;;  %v3483_v54 = vld [vmem:[#allocation6 + $0x54c] sm:$0xf]  ;;  %v3533_v61 = vld [vmem:[#allocation9 + $0xb4] sm:$0xf0]  ;;  %v3110_v30 = vld [vmem:[#allocation9 + $0x68] sm:$0xf0] }
  0xc3   :  { %1594 = vmatpush.bf16.msrb.mxu1 %v2621_v62  ;;  %v2685_v62 = vor.u32 %v3415_v48, %v2682_v49  ;;  %v2957_v2 = vor.u32 %v3483_v54, %v2954_v55  ;;  %v3156_v49 = vld [vmem:[#allocation9 + $0xc0] sm:$0xf]  ;;  %v3084_v54 = vld [vmem:[#allocation9 + $0x30] sm:$0xf] }
  0xc4   :  { %1619 = vmatpush.bf16.msra.mxu2 %v2893_v59  ;;  %v3447_v59 = vld [vmem:[#allocation6 + $0x42c] sm:$0xf] }
  0xc5   :  { %1607 = vmatpush.bf16.msrb.mxu3 %v2749_v1  ;;  %v2666_v1 = vld [vmem:[#allocation6 + $0x318] sm:$0xf0] }
  0xc6   :  { %1632 = vmatpush.bf16.msrb.mxu0 %v3021_v4  ;;  %v1317_v4 = vpop.f32.mrf.mxu1  ;;  %v1330_v12 = vpop.f32.mrf.mxu2  ;;  %v2669_v16 = vor.u32 %v3411_v0, %v2666_v1  ;;  %v3515_v0 = vld [vmem:[#allocation9 + $0x24] sm:$0xf0] }
  0xc7   :  { %1595 = vmatpush.bf16.msrb.mxu1 %v2605_v11  ;;  %v2938_v11 = vld [vmem:[#allocation6 + $0x538] sm:$0xf0]  ;;  %v3077_v3 = vor.u32 %v3515_v0, %v3076_v63  ;;  %v3068_v4 = vld [vmem:[#allocation9 + $0x10] sm:$0xf]  ;;  %v3236_v63 = vld [vmem:[#allocation9 + $0x160] sm:$0xf] }
  0xc8   :  { %1620 = vmatpush.bf16.msra.mxu2 %v2877_v7  ;;  %v2813_v7 = vor.u32 %v3447_v59, %v2810_v60  ;;  %v3157_v59 = vor.u32 %v3535_v50, %v3156_v49  ;;  %v3148_v60 = vld [vmem:[#allocation9 + $0xb0] sm:$0xf]  ;;  %v3557_v49 = vld [vmem:[#allocation9 + $0x174] sm:$0xf0]  ;;  %v3555_v0 = vld [vmem:[#allocation9 + $0x164] sm:$0xf0] }
  0xc9   :  { %1608 = vmatpush.bf16.msrb.mxu3 %v2733_v14  ;;  %v3443_v14 = vld [vmem:[#allocation6 + $0x40c] sm:$0xf]  ;;  %v1343_v18 = vpop.f32.mrf.mxu3 }
  0xca   :  { %1633 = vmatpush.bf16.msrb.mxu0 %v3005_v17  ;;  %v3053_v17 = vor.u32 %v3507_v5, %v3050_v6  ;;  %v2797_v24 = vor.u32 %v3443_v14, %v2794_v15  ;;  %v3513_v5 = vld [vmem:[#allocation9 + $0x14] sm:$0xf0] }
  0xcb   :  { %1596 = vmatpush.bf16.msrb.mxu1 %v2589_v23  ;;  %v2941_v23 = vor.u32 %v3479_v10, %v2938_v11  ;;  %v3529_v14 = vld [vmem:[#allocation9 + $0x94] sm:$0xf0]  ;;  %v3069_v15 = vor.u32 %v3513_v5, %v3068_v4  ;;  %v3228_v4 = vld [vmem:[#allocation9 + $0x150] sm:$0xf]  ;;  %v3514_v5 = vld [vmem:[#allocation9 + $0x24] sm:$0xf] }
  0xcc   :  { %1621 = vmatpush.bf16.msra.mxu2 %v2861_v56  ;;  %v3541_v56 = vld [vmem:[#allocation9 + $0xf4] sm:$0xf0] }
  0xcd   :  { %1609 = vmatpush.bf16.msrb.mxu3 %v2717_v8  ;;  %v3523_v8 = vld [vmem:[#allocation9 + $0x64] sm:$0xf0] }
  0xce   :  { %1634 = vmatpush.bf16.msrb.mxu0 %v2989_v28  ;;  %v3181_v28 = vor.u32 %v3541_v56, %v3180_v19  ;;  %v3109_v20 = vor.u32 %v3523_v8, %v3108_v25  ;;  %v1380_v40 = vpop.f32.mrf.mxu2  ;;  %v3524_v19 = vld [vmem:[#allocation9 + $0x74] sm:$0xf]  ;;  %v3118_v56 = vld [vmem:[#allocation9 + $0x78] sm:$0xf0] }
  0xcf   :  { %1597 = vmatpush.bf16.msrb.mxu1 %v2573_v39  ;;  %v3521_v39 = vld [vmem:[#allocation9 + $0x54] sm:$0xf0]  ;;  %v3182_v25 = vld [vmem:[#allocation9 + $0xf8] sm:$0xf0]  ;;  %v3121_v8 = vor.u32 %v3524_v19, %v3118_v56 }
  0xd0   :  { %1622 = vmatpush.bf16.msra.mxu2 %v2845_v33  ;;  %v1316_v33 = vadd.f32 %v3824_v29, %v1303_v21  ;;  %v3101_v29 = vor.u32 %v3521_v39, %v3100_v35  ;;  %v3124_v21 = vld [vmem:[#allocation9 + $0x80] sm:$0xf]  ;;  %v3538_v35 = vld [vmem:[#allocation9 + $0xe4] sm:$0xf]  ;;  %v3174_v39 = vld [vmem:[#allocation9 + $0xe8] sm:$0xf0] }
  0xd1   :  { %1610 = vmatpush.bf16.msrb.mxu3 %v2701_v42  ;;  %v3164_v42 = vld [vmem:[#allocation9 + $0xd0] sm:$0xf] }
  0xd2   :  { %1635 = vmatpush.bf16.msrb.mxu0 %v2973_v47  ;;  %v1329_v45 = vadd.f32 %v3828_v38, %v1316_v33  ;;  %v3092_v47 = vld [vmem:[#allocation9 + $0x40] sm:$0xf]  ;;  %v3165_v48 = vor.u32 %v3537_v44, %v3164_v42  ;;  %v3517_v38 = vld [vmem:[#allocation9 + $0x34] sm:$0xf0]  ;;  %v3520_v42 = vld [vmem:[#allocation9 + $0x54] sm:$0xf] }
  0xd3   :  { %1598 = vmatpush.bf16.msrb.mxu1 %v2557_v57  ;;  %v3102_v44 = vld [vmem:[#allocation9 + $0x58] sm:$0xf0] }
  0xd4   :  { %1623 = vmatpush.bf16.msra.mxu2 %v2829_v53  ;;  %v3105_v50 = vor.u32 %v3520_v42, %v3102_v44  ;;  %v3526_v42 = vld [vmem:[#allocation9 + $0x84] sm:$0xf]  ;;  %v3126_v44 = vld [vmem:[#allocation9 + $0x88] sm:$0xf0] }
  0xd5   :  { %1611 = vmatpush.bf16.msrb.mxu3 %v2685_v62  ;;  %v3085_v62 = vor.u32 %v3517_v38, %v3084_v54 }
  0xd6   :  { %1636 = vmatpush.bf16.msrb.mxu0 %v2957_v2  ;;  %v1354_v53 = vpop.f32.mrf.mxu0  ;;  %v3531_v2 = vld [vmem:[#allocation9 + $0xa4] sm:$0xf0] }
  0xd7   :  { %1599 = vmatpush.bf16.msrb.mxu1 %v2541_v13  ;;  %v1367_v57 = vpop.f32.mrf.mxu1  ;;  %v3132_v13 = vld [vmem:[#allocation9 + $0x90] sm:$0xf] }
  0xd8   :  { %1624 = vmatpush.bf16.msra.mxu2 %v2813_v7 }
  0xd9   :  { %1612 = vmatpush.bf16.msrb.mxu3 %v2669_v16  ;;  %v3060_v16 = vld [vmem:[#allocation9] sm:$0xf] }
  0xda   :  { %1637 = vmatpush.bf16.msrb.mxu0 %v2941_v23  ;;  %1600 = vmatmul.bf16.vlgmr.msrb.gmra.mxu1 %v3782_v52  ;;  %v3519_v52 = vld [vmem:[#allocation9 + $0x44] sm:$0xf0] }
  0xdb   :  { %1651 = vmatpush.bf16.msra.mxu1 %v3053_v17  ;;  %v3093_v51 = vor.u32 %v3519_v52, %v3092_v47  ;;  %v3511_v17 = vld [vmem:[#allocation9 + $0x4] sm:$0xf0]  ;;  %v3536_v52 = vld [vmem:[#allocation9 + $0xd4] sm:$0xf] }
  0xdc   :  { %1625 = vmatpush.bf16.msra.mxu2 %v2797_v24  ;;  %1613 = vmatmul.bf16.vlgmr.msrb.gmra.mxu3 %v3786_v58  ;;  %v1342_v58 = vadd.f32 %v3830_v43, %v1329_v45  ;;  %v3149_v43 = vor.u32 %v3533_v61, %v3148_v60  ;;  %v3061_v23 = vor.u32 %v3511_v17, %v3060_v16  ;;  %v3540_v24 = vld [vmem:[#allocation9 + $0xf4] sm:$0xf]  ;;  %v3086_v60 = vld [vmem:[#allocation9 + $0x38] sm:$0xf0] }
  0xdd   :  { %2063 = vmatpush.bf16.msra.mxu3 %v3117_v22  ;;  %v3527_v22 = vld [vmem:[#allocation9 + $0x84] sm:$0xf0]  ;;  %v3177_v45 = vor.u32 %v3538_v35, %v3174_v39  ;;  %v3512_v16 = vld [vmem:[#allocation9 + $0x14] sm:$0xf]  ;;  %v3070_v17 = vld [vmem:[#allocation9 + $0x18] sm:$0xf0] }
  0xde   :  { %1638 = vmatpush.bf16.msrb.mxu0 %v2925_v34  ;;  %v1355_v55 = vadd.f32 %v1354_v53, %v1342_v58  ;;  %v1356_v6 = vpop.f32.mrf.mxu0  ;;  %v3125_v32 = vor.u32 %v3527_v22, %v3124_v21  ;;  %v302_v34 = vperm.slane %v3826_v37, 1  ;;  %v3094_v53 = vld [vmem:[#allocation9 + $0x48] sm:$0xf0]  ;;  %v3551_v21 = vld [vmem:[#allocation9 + $0x144] sm:$0xf0] }
  0xdf   :  { %2076 = vmatpush.bf16.msrb.mxu1 %v3181_v28  ;;  %1626 = vmatmul.bf16.vlgmr.msra.gmra.mxu2 %v3798_v31  ;;  %v1382_v31 = vpop.f32.mrf.mxu2  ;;  %v1393_v7 = vpop.f32.mrf.mxu3  ;;  %v3522_v28 = vld [vmem:[#allocation9 + $0x64] sm:$0xf]  ;;  %v3078_v6 = vld [vmem:[#allocation9 + $0x28] sm:$0xf0]  ;;  %v3204_v35 = vld [vmem:[#allocation9 + $0x120] sm:$0xf] }
  0xe0   :  { %v1368_v1 = vadd.f32 %v1367_v57, %v1355_v55  ;;  %v1369_v10 = vpop.f32.mrf.mxu1  ;;  %v1394_v47 = vadd.f32 %v1393_v7, %v302_v34  ;;  %v3534_v55 = vld [vmem:[#allocation9 + $0xc4] sm:$0xf]  ;;  %v3158_v57 = vld [vmem:[#allocation9 + $0xc8] sm:$0xf0]  ;;  %v3553_v7 = vld [vmem:[#allocation9 + $0x154] sm:$0xf0] }
  0xe1   :  { %2064 = vmatpush.bf16.msra.mxu3 %v3109_v20  ;;  %1639 = vmatmul.bf16.vlgmr.msrb.gmra.mxu0 %v3800_v36  ;;  %v3140_v36 = vld [vmem:[#allocation9 + $0xa0] sm:$0xf]  ;;  %v3185_v20 = vor.u32 %v3540_v24, %v3182_v25  ;;  %v3528_v24 = vld [vmem:[#allocation9 + $0x94] sm:$0xf]  ;;  %v3134_v25 = vld [vmem:[#allocation9 + $0x98] sm:$0xf0] }
  0xe2   :  { %v1381_v9 = vadd.f32 %v1380_v40, %v1368_v1  ;;  %v3141_v11 = vor.u32 %v3531_v2, %v3140_v36  ;;  %v3150_v36 = vld [vmem:[#allocation9 + $0xb8] sm:$0xf0]  ;;  %v3237_v2 = vor.u32 %v3555_v0, %v3236_v63  ;;  %v3137_v34 = vor.u32 %v3528_v24, %v3134_v25  ;;  %v3547_v39 = vld [vmem:[#allocation9 + $0x124] sm:$0xf0]  ;;  %v3554_v0 = vld [vmem:[#allocation9 + $0x164] sm:$0xf] }
  0xe3   :  { %2077 = vmatpush.bf16.msrb.mxu1 %v3173_v41  ;;  %v3113_v41 = vor.u32 %v3522_v28, %v3110_v30  ;;  %v3549_v28 = vld [vmem:[#allocation9 + $0x134] sm:$0xf0]  ;;  %v3510_v30 = vld [vmem:[#allocation9 + $0x4] sm:$0xf]  ;;  %v3284_v24 = vld [vmem:[#allocation9 + $0x1c0] sm:$0xf] }
  0xe4   :  { %v1661_v18 = vmul.f32 0.2, %v1381_v9  ;;  %vm1657_vm1 = vcmp.gt.f32.partialorder %v1381_v9, 0.0  ;;  %v3567_v25 = vld [vmem:[#allocation9 + $0x1c4] sm:$0xf0] }
  0xe5   :  { %2065 = vmatpush.bf16.msra.mxu3 %v3101_v29  ;;  %v3244_v29 = vld [vmem:[#allocation9 + $0x170] sm:$0xf] }
  0xe6   :  { %v1665_v27 = vsel %vm1657_vm1, %v1381_v9, %v1661_v18  ;;  %v3245_v58 = vor.u32 %v3557_v49, %v3244_v29  ;;  %v3205_v29 = vor.u32 %v3547_v39, %v3204_v35  ;;  %v3196_v49 = vld [vmem:[#allocation9 + $0x110] sm:$0xf]  ;;  %v3198_v35 = vld [vmem:[#allocation9 + $0x118] sm:$0xf0] }
  0xe7   :  { %2078 = vmatpush.bf16.msrb.mxu1 %v3165_v48  ;;  %v1406_v12 = vpop.f32.mrf.mxu2  ;;  %v1395_v26 = vpop.f32.mrf.mxu3  ;;  %v3844_v40 = vpack.c.bf16 %v1665_v27, %v1665_v27  ;;  %v3166_v48 = vld [vmem:[#allocation9 + $0xd8] sm:$0xf0]  ;;  %v3212_v27 = vld [vmem:[#allocation9 + $0x130] sm:$0xf] }
  0xe8   :  { %v3169_v54 = vor.u32 %v3536_v52, %v3166_v48  ;;  %2089 = vmatpush.bf16.msrb.mxu2 %v3245_v58  ;;  %v1407_v38 = vadd.f32 %v1406_v12, %v1394_v47  ;;  %v3073_v26 = vor.u32 %v3512_v16, %v3070_v17  ;;  %v3129_v48 = vor.u32 %v3526_v42, %v3126_v44 }
  0xe9   :  { %2066 = vmatpush.bf16.msra.mxu3 %v3093_v51  ;;  %v3518_v51 = vld [vmem:[#allocation9 + $0x44] sm:$0xf] }
  0xea   :  { %3057 = vmatmul.msk.bf16.vlgmr.msra.gmra.mxu1 %vm1289_vm0, %v3794_v46  ;;  %v3133_v46 = vor.u32 %v3529_v14, %v3132_v13  ;;  %v3097_v31 = vor.u32 %v3518_v51, %v3094_v53  ;;  %v3530_v13 = vld [vmem:[#allocation9 + $0xa4] sm:$0xf]  ;;  %v3142_v14 = vld [vmem:[#allocation9 + $0xa8] sm:$0xf0] }
  0xeb   :  { %2079 = vmatpush.bf16.msrb.mxu1 %v3157_v59  ;;  %v3516_v59 = vld [vmem:[#allocation9 + $0x34] sm:$0xf]  ;;  %v3145_v56 = vor.u32 %v3530_v13, %v3142_v14  ;;  %v3222_v14 = vld [vmem:[#allocation9 + $0x148] sm:$0xf0] }
  0xec   :  { %2090 = vmatpush.bf16.msrb.mxu2 %v3237_v2 }
  0xed   :  { %2067 = vmatpush.bf16.msra.mxu3 %v3085_v62  ;;  %v3161_v62 = vor.u32 %v3534_v55, %v3158_v57 }
  0xef   :  { %2080 = vmatpush.bf16.msrb.mxu1 %v3149_v43  ;;  %v1408_v33 = vpop.f32.mrf.mxu2  ;;  %v3532_v43 = vld [vmem:[#allocation9 + $0xb4] sm:$0xf] }
  0xf0   :  { %v3153_v10 = vor.u32 %v3532_v43, %v3150_v36  ;;  %v3213_v33 = vor.u32 %v3549_v28, %v3212_v27  ;;  %v3206_v27 = vld [vmem:[#allocation9 + $0x128] sm:$0xf0] }
  0xf1   :  { %2068 = vmatpush.bf16.msra.mxu3 %v3077_v3  ;;  %v3089_v3 = vor.u32 %v3516_v59, %v3086_v60  ;;  %v3543_v59 = vld [vmem:[#allocation9 + $0x104] sm:$0xf0] }
  0xf3   :  { %2081 = vmatpush.bf16.msrb.mxu1 %v3141_v11  ;;  %v3229_v11 = vor.u32 %v3553_v7, %v3228_v4  ;;  %v3552_v4 = vld [vmem:[#allocation9 + $0x154] sm:$0xf] }
  0xf5   :  { %2069 = vmatpush.bf16.msra.mxu3 %v3069_v15  ;;  %v3081_v15 = vor.u32 %v3514_v5, %v3078_v6  ;;  %2091 = vmatpush.bf16.msrb.mxu2 %v3229_v11  ;;  %v3230_v6 = vld [vmem:[#allocation9 + $0x158] sm:$0xf0]  ;;  %v3571_v11 = vld [vmem:[#allocation9 + $0x1e4] sm:$0xf0] }
  0xf6   :  { %v1419_v61 = vpop.f32.mrf.mxu0  ;;  %v3233_v7 = vor.u32 %v3552_v4, %v3230_v6 }
  0xf7   :  { %2082 = vmatpush.bf16.msrb.mxu1 %v3133_v46  ;;  %v1420_v1 = vadd.f32 %v1419_v61, %v1407_v38  ;;  %v1432_v9 = vpop.f32.mrf.mxu1  ;;  %v3220_v46 = vld [vmem:[#allocation9 + $0x140] sm:$0xf]  ;;  %v3556_v61 = vld [vmem:[#allocation9 + $0x174] sm:$0xf] }
  0xf9   :  { %2070 = vmatpush.bf16.msra.mxu3 %v3061_v23  ;;  %v1433_v12 = vadd.f32 %v1432_v9, %v1420_v1  ;;  %v3238_v1 = vld [vmem:[#allocation9 + $0x168] sm:$0xf0] }
  0xfa   :  { %v3241_v43 = vor.u32 %v3554_v0, %v3238_v1 }
  0xfb   :  { %2083 = vmatpush.bf16.msrb.mxu1 %v3125_v32  ;;  %v3062_v32 = vld [vmem:[#allocation9 + $0x8] sm:$0xf0] }
  0xfc   :  { %2071 = vmatmul.bf16.vlgmr.msra.gmra.mxu3 %v3844_v40 }
  0xfd   :  { %2115 = vmatpush.bf16.msrb.mxu3 %v3121_v8  ;;  %v3221_v8 = vor.u32 %v3551_v21, %v3220_v46  ;;  %v3548_v46 = vld [vmem:[#allocation9 + $0x134] sm:$0xf] }
  0xfe   :  { %v1421_v18 = vpop.f32.mrf.mxu0 }
  0xff   :  { %2128 = vmatpush.bf16.msra.mxu1 %v3185_v20  ;;  %v1445_v19 = vpop.f32.mrf.mxu3  ;;  %2092 = vmatpush.bf16.msrb.mxu2 %v3221_v8  ;;  %v1434_v20 = vpop.f32.mrf.mxu1  ;;  %v3285_v8 = vor.u32 %v3567_v25, %v3284_v24  ;;  %v3270_v24 = vld [vmem:[#allocation9 + $0x1a8] sm:$0xf0]  ;;  %v304_v25 = vperm.slane %v3826_v37, 3 }
 0x100   :  { %v1446_v22 = vadd.f32 %v1445_v19, %v1433_v12  ;;  %v3550_v12 = vld [vmem:[#allocation9 + $0x144] sm:$0xf]  ;;  %v3292_v19 = vld [vmem:[#allocation9 + $0x1d0] sm:$0xf]  ;;  %v303_v20 = vperm.slane %v3826_v37, 2 }
 0x101   :  { %2116 = vmatpush.bf16.msrb.mxu3 %v3113_v41 }
 0x102   :  { %v1458_v23 = vpop.f32.mrf.mxu2 }
 0x103   :  { %2129 = vmatpush.bf16.msra.mxu1 %v3177_v45  ;;  %v1459_v41 = vadd.f32 %v1458_v23, %v1446_v22  ;;  %v3065_v45 = vor.u32 %v3510_v30, %v3062_v32  ;;  %2093 = vmatpush.bf16.msrb.mxu2 %v3213_v33  ;;  %v3214_v22 = vld [vmem:[#allocation9 + $0x138] sm:$0xf0]  ;;  %v3276_v32 = vld [vmem:[#allocation9 + $0x1b0] sm:$0xf]  ;;  %v3565_v33 = vld [vmem:[#allocation9 + $0x1b4] sm:$0xf0] }
 0x104   :  { %v3217_v23 = vor.u32 %v3548_v46, %v3214_v22  ;;  %v3564_v46 = vld [vmem:[#allocation9 + $0x1b4] sm:$0xf] }
 0x105   :  { %2117 = vmatpush.bf16.msrb.mxu3 %v3105_v50  ;;  %v3545_v50 = vld [vmem:[#allocation9 + $0x114] sm:$0xf0] }
 0x106   :  { %v1471_v47 = vpop.f32.mrf.mxu0 }
 0x107   :  { %2130 = vmatpush.bf16.msra.mxu1 %v3169_v54  ;;  %v1447_v52 = vpop.f32.mrf.mxu3  ;;  %v1472_v58 = vadd.f32 %v1471_v47, %v1459_v41  ;;  %2094 = vmatpush.bf16.msrb.mxu2 %v3205_v29  ;;  %v3197_v54 = vor.u32 %v3545_v50, %v3196_v49  ;;  %v3277_v41 = vor.u32 %v3565_v33, %v3276_v32  ;;  %v3268_v29 = vld [vmem:[#allocation9 + $0x1a0] sm:$0xf]  ;;  %v3563_v47 = vld [vmem:[#allocation9 + $0x1a4] sm:$0xf0]  ;;  %v3190_v50 = vld [vmem:[#allocation9 + $0x108] sm:$0xf0] }
 0x108   :  { %v3542_v52 = vld [vmem:[#allocation9 + $0x104] sm:$0xf]  ;;  %v3269_v49 = vor.u32 %v3563_v47, %v3268_v29 }
 0x109   :  { %2118 = vmatpush.bf16.msrb.mxu3 %v3097_v31  ;;  %vm1658_vm2 = vcmp.gt.f32.partialorder %v1472_v58, 0.0  ;;  %v1662_v53 = vmul.f32 0.2, %v1472_v58  ;;  %v3188_v31 = vld [vmem:[#allocation9 + $0x100] sm:$0xf] }
 0x10a   :  { %v1460_v51 = vpop.f32.mrf.mxu2  ;;  %v3189_v60 = vor.u32 %v3543_v59, %v3188_v31  ;;  %v3252_v31 = vld [vmem:[#allocation9 + $0x180] sm:$0xf]  ;;  %v3559_v59 = vld [vmem:[#allocation9 + $0x184] sm:$0xf0] }
 0x10b   :  { %2131 = vmatpush.bf16.msra.mxu1 %v3161_v62  ;;  %v1666_v38 = vsel %vm1658_vm2, %v1472_v58, %v1662_v53  ;;  %2095 = vmatpush.bf16.msrb.mxu2 %v3197_v54  ;;  %v3246_v62 = vld [vmem:[#allocation9 + $0x178] sm:$0xf0]  ;;  %v3193_v58 = vor.u32 %v3542_v52, %v3190_v50  ;;  %v3260_v53 = vld [vmem:[#allocation9 + $0x190] sm:$0xf]  ;;  %v3561_v54 = vld [vmem:[#allocation9 + $0x194] sm:$0xf0] }
 0x10c   :  { %v1670_v55 = vpack.c.bf16 %v1666_v38, %v1666_v38  ;;  %v3249_v63 = vor.u32 %v3556_v61, %v3246_v62  ;;  %v3253_v61 = vor.u32 %v3559_v59, %v3252_v31  ;;  %v3572_v62 = vld [vmem:[#allocation9 + $0x1f4] sm:$0xf]  ;;  %v1737_v31 = vld [vmem:[%s3866_s4] sm:$0x3] }
 0x10d   :  { %2119 = vmatpush.bf16.msrb.mxu3 %v3089_v3  ;;  %v3573_v3 = vld [vmem:[#allocation9 + $0x1f4] sm:$0xf0]  ;;  %v1739_v59 = vperm.slane %v1737_v31, 0 }
 0x10e   :  { %2084 = vmatmul.bf16.vlgmr.msrb.gmra.mxu1 %v1670_v55  ;;  %v1473_v57 = vpop.f32.mrf.mxu0 }
 0x10f   :  { %2132 = vmatpush.bf16.msra.mxu1 %v3153_v10  ;;  %2096 = vmatpush.bf16.msrb.mxu2 %v3189_v60  ;;  %v3300_v10 = vld [vmem:[#allocation9 + $0x1e0] sm:$0xf]  ;;  %v3261_v57 = vor.u32 %v3561_v54, %v3260_v53 }
 0x110   :  { %v3301_v13 = vor.u32 %v3571_v11, %v3300_v10  ;;  %v3568_v10 = vld [vmem:[#allocation9 + $0x1d4] sm:$0xf]  ;;  %v3294_v11 = vld [vmem:[#allocation9 + $0x1d8] sm:$0xf0] }
 0x111   :  { %2120 = vmatpush.bf16.msrb.mxu3 %v3081_v15  ;;  %v3225_v15 = vor.u32 %v3550_v12, %v3222_v14  ;;  %v3297_v14 = vor.u32 %v3568_v10, %v3294_v11  ;;  %v3725_v10 = vmov 0  }
 0x112   :  { %3584 = vset.pattern.permute.xlu0 %v3725_v10 }
 0x113   :  { %2133 = vmatpush.bf16.msra.mxu1 %v3145_v56  ;;  %2141 = vmatpush.bf16.msra.mxu2 %v3249_v63  ;;  %v3569_v56 = vld [vmem:[#allocation9 + $0x1d4] sm:$0xf0]  ;;  %v3310_v63 = vld [vmem:[#allocation9 + $0x1f8] sm:$0xf0] }
 0x114   :  { %v3293_v21 = vor.u32 %v3569_v56, %v3292_v19  ;;  %v3313_v0 = vor.u32 %v3572_v62, %v3310_v63 }
 0x115   :  { %2121 = vmatpush.bf16.msrb.mxu3 %v3073_v26  ;;  %v3546_v26 = vld [vmem:[#allocation9 + $0x124] sm:$0xf] }
 0x116   :  { %v3209_v30 = vor.u32 %v3546_v26, %v3206_v27  ;;  %v3560_v26 = vld [vmem:[#allocation9 + $0x194] sm:$0xf]  ;;  %v3262_v27 = vld [vmem:[#allocation9 + $0x198] sm:$0xf0] }
 0x117   :  { %2134 = vmatpush.bf16.msra.mxu1 %v3137_v34  ;;  %2142 = vmatpush.bf16.msra.mxu2 %v3241_v43  ;;  %v1484_v2 = vpop.f32.mrf.mxu1  ;;  %v3544_v34 = vld [vmem:[#allocation9 + $0x114] sm:$0xf] }
 0x118   :  { %v3201_v44 = vor.u32 %v3544_v34, %v3198_v35  ;;  %v3254_v34 = vld [vmem:[#allocation9 + $0x188] sm:$0xf0] }
 0x119   :  { %2122 = vmatpush.bf16.msrb.mxu3 %v3065_v45  ;;  %v1485_v45 = vadd.f32 %v1484_v2, %v303_v20  ;;  %v3558_v20 = vld [vmem:[#allocation9 + $0x184] sm:$0xf] }
 0x11a   :  { %v3848_v36 = vpop.f32.mrf.mxu0  ;;  %v3257_v35 = vor.u32 %v3558_v20, %v3254_v34 }
 0x11b   :  { %2135 = vmatpush.bf16.msra.mxu1 %v3129_v48  ;;  %2143 = vmatpush.bf16.msra.mxu2 %v3233_v7 }
 0x11c   :  { %2123 = vmatmul.bf16.vlgmr.msrb.gmra.mxu3 %v3844_v40  ;;  %v3308_v40 = vld [vmem:[#allocation9 + $0x1f0] sm:$0xf] }
 0x11d   :  { %v3309_v5 = vor.u32 %v3573_v3, %v3308_v40  ;;  %v3570_v40 = vld [vmem:[#allocation9 + $0x1e4] sm:$0xf]  ;;  %v3302_v3 = vld [vmem:[#allocation9 + $0x1e8] sm:$0xf0] }
 0x11e   :  { %2136 = vmatmul.bf16.vlgmr.msra.gmra.mxu1 %v1670_v55 }
 0x11f   :  { %2102 = vmatpush.bf16.msra.mxu0 %v3309_v5  ;;  %v1497_v9 = vpop.f32.mrf.mxu3  ;;  %v1486_v18 = vpop.f32.mrf.mxu1  ;;  %2144 = vmatpush.bf16.msra.mxu2 %v3225_v15 }
 0x120   :  { %v1498_v48 = vadd.f32 %v1497_v9, %v1485_v45  ;;  %v3286_v18 = vld [vmem:[#allocation9 + $0x1c8] sm:$0xf0] }
 0x122   :  { %v1512_v16 = vpop.f32.mrf.mxu0  ;;  %v1523_v17 = vpop.f32.mrf.mxu2  ;;  %v1511_v38 = vadd.f32 %v3848_v36, %v1498_v48  ;;  %v3305_v36 = vor.u32 %v3570_v40, %v3302_v3 }
 0x123   :  { %2103 = vmatpush.bf16.msra.mxu0 %v3301_v13  ;;  %2145 = vmatpush.bf16.msra.mxu2 %v3217_v23  ;;  %v3562_v23 = vld [vmem:[#allocation9 + $0x1a4] sm:$0xf] }
 0x124   :  { %v1524_v60 = vadd.f32 %v1523_v17, %v1511_v38  ;;  %v3566_v17 = vld [vmem:[#allocation9 + $0x1c4] sm:$0xf] }
 0x125   :  { %v3289_v19 = vor.u32 %v3566_v17, %v3286_v18 }
 0x127   :  { %2104 = vmatpush.bf16.msra.mxu0 %v3293_v21  ;;  %v1499_v28 = vpop.f32.mrf.mxu3  ;;  %2146 = vmatpush.bf16.msra.mxu2 %v3209_v30  ;;  %v3278_v21 = vld [vmem:[#allocation9 + $0x1b8] sm:$0xf0]  ;;  %v3265_v30 = vor.u32 %v3560_v26, %v3262_v27 }
 0x128   :  { %v3281_v22 = vor.u32 %v3564_v46, %v3278_v21 }
 0x12a   :  { %v1562_v39 = vpop.f32.mrf.mxu0  ;;  %v1525_v42 = vpop.f32.mrf.mxu2 }
 0x12b   :  { %2105 = vmatpush.bf16.msra.mxu0 %v3285_v8  ;;  %2147 = vmatpush.bf16.msra.mxu2 %v3201_v44  ;;  %v3273_v8 = vor.u32 %v3562_v23, %v3270_v24 }
 0x12f   :  { %2106 = vmatpush.bf16.msra.mxu0 %v3277_v41  ;;  %2148 = vmatpush.bf16.msra.mxu2 %v3193_v58 }
 0x132   :  { %v1564_v51 = vpop.f32.mrf.mxu0 }
 0x133   :  { %2107 = vmatpush.bf16.msra.mxu0 %v3269_v49 }
 0x137   :  { %v1536_v55 = vpop.f32.mrf.mxu1  ;;  %2108 = vmatpush.bf16.msra.mxu0 %v3261_v57 }
 0x138   :  { %v1537_v1 = vadd.f32 %v1536_v55, %v1524_v60 }
 0x13b   :  { %2109 = vmatpush.bf16.msra.mxu0 %v3253_v61 }
 0x13e   :  { %v1588_v43 = vpop.f32.mrf.mxu0 }
 0x13f   :  { %v1549_v2 = vpop.f32.mrf.mxu3  ;;  %2154 = vmatpush.bf16.msrb.mxu0 %v3313_v0  ;;  %v1538_v5 = vpop.f32.mrf.mxu1 }
 0x140   :  { %v1550_v4 = vadd.f32 %v1549_v2, %v1537_v1  ;;  %v1740_v1 = vperm.slane %v1737_v31, 1 }
 0x142   :  { %v1563_v6 = vadd.f32 %v1562_v39, %v1550_v4  ;;  %v1575_v7 = vpop.f32.mrf.mxu2 }
 0x143   :  { %2155 = vmatpush.bf16.msrb.mxu0 %v3305_v36  ;;  %v1576_v28 = vadd.f32 %v1575_v7, %v304_v25  ;;  %v2174_v7 = vld [vmem:[#allocation2] sm:$0x1] }
 0x144   :  { %vm1659_vm3 = vcmp.gt.f32.partialorder %v1563_v6, 0.0  ;;  %v1663_v9 = vmul.f32 0.2, %v1563_v6  ;;  %2177 = vperm.xlu0 %3584, %v2174_v7  }
 0x145   :  { %v1589_v33 = vadd.f32 %v1588_v43, %v1576_v28 }
 0x146   :  { %v1667_v12 = vsel %vm1659_vm3, %v1563_v6, %v1663_v9  ;;  %v1590_v13 = vpop.f32.mrf.mxu0 }
 0x147   :  { %v1671_v15 = vpack.c.bf16 %v1667_v12, %v1667_v12  ;;  %v1551_v16 = vpop.f32.mrf.mxu3  ;;  %2156 = vmatpush.bf16.msrb.mxu0 %v3297_v14  ;;  %v2173_v14 = vld [vmem:[%s3867_s5] sm:$0x3]  ;;  %s3726_s5 = smov [#allocation11]  }
 0x148   :  { %v2182_v17 = vperm.slane %v2173_v14, 0  ;;  %v2183_v23 = vperm.slane %v2173_v14, 1  ;;  %s2256_s25 = sshll.u32 %s3726_s5, 4  ;;  %s2257_s25 = int_to_ptr.vmem [resolvable:$true] %s2256_s25 }
 0x149   :  { %2097 = vmatmul.bf16.vlgmr.msrb.gmra.mxu2 %v1671_v15 }
 0x14a   :  { %v1577_v56 = vpop.f32.mrf.mxu2 }
 0x14b   :  { %2157 = vmatpush.bf16.msrb.mxu0 %v3289_v19 }
 0x14f   :  { %2158 = vmatpush.bf16.msrb.mxu0 %v3281_v22 }
 0x153   :  { %2159 = vmatpush.bf16.msrb.mxu0 %v3273_v8 }
 0x157   :  { %v1601_v32 = vpop.f32.mrf.mxu1  ;;  %2160 = vmatpush.bf16.msrb.mxu0 %v3265_v30 }
 0x158   :  { %v1602_v39 = vadd.f32 %v1601_v32, %v1589_v33 }
 0x159   :  { %2149 = vmatmul.bf16.vlgmr.msra.gmra.mxu2 %v1671_v15 }
 0x15b   :  { %2161 = vmatpush.bf16.msrb.mxu0 %v3257_v35 }
 0x15e   :  { %v1640_v42 = vpop.f32.mrf.mxu0 }
 0x15f   :  { %v1614_v41 = vpop.f32.mrf.mxu3  ;;  %v1603_v37 = vpop.f32.mrf.mxu1 }
 0x160   :  { %v1615_v44 = vadd.f32 %v1614_v41, %v1602_v39 }
 0x162   :  { %v1627_v45 = vpop.f32.mrf.mxu2 }
 0x163   :  { %v1628_v29 = vadd.f32 %v1627_v45, %v1615_v44 }
 0x165   :  { %v1641_v48 = vadd.f32 %v1640_v42, %v1628_v29 }
 0x166   :  { %v1642_v52 = vpop.f32.mrf.mxu0 }
 0x167   :  { %v1616_v47 = vpop.f32.mrf.mxu3  ;;  %v1653_v49 = vpop.f32.mrf.mxu1 }
 0x168   :  { %v1654_v50 = vadd.f32 %v1653_v49, %v1641_v48 }
 0x16a   :  { %v1629_v58 = vpop.f32.mrf.mxu2  ;;  %vm1660_vm4 = vcmp.gt.f32.partialorder %v1654_v50, 0.0  ;;  %v1664_v51 = vmul.f32 0.2, %v1654_v50 }
 0x16c   :  { %v1668_v53 = vsel %vm1660_vm4, %v1654_v50, %v1664_v51 }
 0x16d   :  { %v1672_v54 = vpack.c.bf16 %v1668_v53, %v1668_v53 }
 0x16f   :  { %v1655_v38 = vpop.f32.mrf.mxu1  ;;  %2110 = vmatmul.bf16.vlgmr.msra.gmra.mxu0 %v1672_v54 }
 0x17f   :  { %v2072_v55 = vpop.f32.mrf.mxu3  ;;  %2162 = vmatmul.bf16.vlgmr.msrb.gmra.mxu0 %v1672_v54 }
 0x180   :  { %v2073_v60 = vadd.f32 %v2072_v55, %v1739_v59 }
 0x187   :  { %v2074_v57 = vpop.f32.mrf.mxu3 }
 0x18b   :  { %v2085_v61 = vpop.f32.mrf.mxu1 }
 0x18c   :  { %v2086_v62 = vadd.f32 %v2085_v61, %v2073_v60 }
 0x193   :  { %v2087_v0 = vpop.f32.mrf.mxu1 }
 0x19b   :  { %v2137_v40 = vpop.f32.mrf.mxu1 }
 0x19f   :  { %v2124_v63 = vpop.f32.mrf.mxu3 }
 0x1a0   :  { %v2125_v2 = vadd.f32 %v2124_v63, %v1740_v1 }
 0x1a2   :  { %v2138_v3 = vadd.f32 %v2137_v40, %v2125_v2 }
 0x1a3   :  { %v2139_v4 = vpop.f32.mrf.mxu1 }
 0x1a7   :  { %v2126_v43 = vpop.f32.mrf.mxu3 }
 0x1b6   :  { %v2178_v8 = vpop.permute.xlu0 %2177 }
 0x1b7   :  { %v2180_v26 = vperm.slane %v2178_v8, 0 }
 0x1cc   :  { %v2098_v5 = vpop.f32.mrf.mxu2 }
 0x1cd   :  { %v2099_v11 = vadd.f32 %v2098_v5, %v2086_v62 }
 0x1d4   :  { %v2100_v36 = vpop.f32.mrf.mxu2 }
 0x1dc   :  { %v2150_v6 = vpop.f32.mrf.mxu2 }
 0x1dd   :  { %v2151_v19 = vadd.f32 %v2150_v6, %v2138_v3 }
 0x1e4   :  { %v2152_v9 = vpop.f32.mrf.mxu2 }
 0x1ec   :  { %v2111_v12 = vpop.f32.mrf.mxu0 }
 0x1ed   :  { %v2112_v13 = vadd.f32 %v2111_v12, %v2099_v11 }
 0x1ef   :  { %vm2167_vm5 = vcmp.gt.f32.partialorder %v2112_v13, 0.0  ;;  %v2169_v15 = vmul.f32 0.2, %v2112_v13 }
 0x1f1   :  { %v2171_v16 = vsel %vm2167_vm5, %v2112_v13, %v2169_v15 }
 0x1f2   :  { %2201 = vmatpush.xpose.msra.mxu3 %v2171_v16 }
 0x1f4   :  { %v2113_v18 = vpop.f32.mrf.mxu0 }
 0x1f5   :  { %2202 = vmatmul.f32.vlgmr.msra.gmra.mxu3 %v2182_v17 }
 0x1fc   :  { %v2163_v56 = vpop.f32.mrf.mxu0 }
 0x1fd   :  { %v2164_v46 = vadd.f32 %v2163_v56, %v2151_v19 }
 0x1ff   :  { %vm2168_vm6 = vcmp.gt.f32.partialorder %v2164_v46, 0.0  ;;  %v2170_v21 = vmul.f32 0.2, %v2164_v46 }
 0x201   :  { %v2172_v22 = vsel %vm2168_vm6, %v2164_v46, %v2170_v21 }
 0x202   :  { %2221 = vmatpush.xpose.msrb.mxu3 %v2172_v22 }
 0x204   :  { %v2165_v24 = vpop.f32.mrf.mxu0 }
 0x205   :  { %2222 = vmatmul.f32.vlgmr.msrb.gmra.mxu3 %v2183_v23 }
 0x278   :  { %v2203_v25 = vpop.f32.mrf.mxu3 }
 0x279   :  { %v2204_v27 = vadd.f32 %v2203_v25, %v2180_v26 }
 0x288   :  { %v2223_v28 = vpop.f32.mrf.mxu3 }
 0x289   :  { %v2224_v30 = vadd.f32 %v2223_v28, %v2204_v27 }
 0x28b   :  { %v2226_v32 = vand.u32 2147483647, %v2224_v30  ;;  %vm2246_vm12 = vcmp.ge.f32.partialorder %v2224_v30, 0.0 }
 0x28d   :  { %v2227_v33 = vsub.f32 0.0, %v2226_v32 }
 0x28f   :  { %v2228_v20 = vmul.f32 1.442695, %v2227_v33 }
 0x291   :  { %3585 = vpow2.f32 %v2228_v20 }
 0x297   :  { %v3586_v34 = vpop.eup %3585 }
 0x298   :  { %v2230_v35 = vadd.f32 1.0, %v3586_v34 }
 0x29a   :  { %3587 = vrcp.f32 %v2230_v35  ;;  %v2242_v44 = vand.u32 2147483648, %v2230_v35  ;;  %v2240_v45 = vand.u32 2147483647, %v2230_v35  ;;  %vm2236_vm8 = vweird.f32 %v2230_v35 }
 0x29c   :  { %v2243_v47 = vor.u32 1.1754944e-38, %v2242_v44  ;;  %vm2241_vm10 = vcmp.eq.f32.partialorder %v2240_v45, 8.507059e+37 }
 0x2a0   :  { %v3588_v39 = vpop.eup %3587 }
 0x2a1   :  { %v2232_v41 = vmul.f32 %v3588_v39, %v2230_v35  ;;  %vm2237_vm7 = vweird.f32 %v3588_v39 }
 0x2a2   :  { %vm2238_vm9 = vmor %vm2236_vm8, %vm2237_vm7 }
 0x2a3   :  { %v2233_v42 = vsub.f32 1.0, %v2232_v41 }
 0x2a5   :  { %v2234_v37 = vmul.f32 %v3588_v39, %v2233_v42 }
 0x2a7   :  { %v2235_v29 = vadd.f32 %v3588_v39, %v2234_v37 }
 0x2a9   :  { %v2239_v52 = vsel %vm2238_vm9, %v3588_v39, %v2235_v29 }
 0x2aa   :  { %v2244_v48 = vsel %vm2241_vm10, %v2243_v47, %v2239_v52 }
 0x2ab   :  { %v2247_v49 = vmul.f32 %v3586_v34, %v2244_v48 }
 0x2ad   :  { %v2248_v50 = vsel %vm2246_vm12, %v2244_v48, %v2247_v49 }
 0x2ae   :  { %2250 = vst.msk [vmem:[#allocation11] sm:$0x1] %vm2249_vm11, %v2248_v50 }
 0x2af   :  { %2261 = dma.vmem_to_hbm [thread:$0]  %s2257_s25, 16, %s2259_s28, [#allocation5]  }
 0x2b0   :  { %3715 = dma.done.wait [#allocation5], 16  }
 0x2b1   :  { %3716 = vsyncadd [#allocation5], 4294967280 }
 0x2b2   :  { %2266 = vsyncpa [#allocation4], 1 }
 0x2b3   :  { %2267 = vsyncpa [#allocation7], 1 }
 0x2b4   :  { %2268 = vsyncpa [#allocation10], 1 }
 0x2b5   :  { %2269 = vsyncpa [#allocation5], 1 }

</bundles_post_ra>
